<compile_context>
chip_gen: v7x
topology: tpu7x:2x2x1
jax: 0.10.0
libtpu: 0.0.40
codegen_flags: <defaults>
</compile_context>

<pallas_src>
import jax
import jax.numpy as jnp
from jax import lax
from jax.experimental import pallas as pl
from jax.experimental.pallas import tpu as pltpu


def convtrans3x3_kernel(xp_ref, w_ref, bias_ref, o_ref, col_ref):
    """One (batch, H-tile) grid step.

    xp_ref  : (1, H+2, W+2, Cin)  padded input image for batch n
    w_ref   : (9*Cin, Cout)       im2col weights, BN scale pre-folded
    bias_ref: (1, Cout)           BN bias row
    o_ref   : (1, TH, W, Cout)    output block (natural NHWC layout)
    col_ref : (TH*W, 9*Cin)       VMEM im2col scratch
    """
    Cin = xp_ref.shape[3]
    W = xp_ref.shape[2] - 2
    TH = o_ref.shape[1]
    Cout = o_ref.shape[3]

    t = pl.program_id(1)
    row0 = pl.multiple_of(t * TH, TH)

    # One aligned dynamic sublane slice for the whole (TH+2)-row slab; the per-ky
    # views below are static offsets into this loaded value.
    slab = xp_ref[0, pl.ds(row0, TH + 2), :, :]              # (TH+2, W+2, Cin)

    # ---- im2col: per ky, pack the three kx patches into one 3*Cin-lane chunk so
    # the scratch is filled with 3 wide stores instead of 9 narrow masked ones. ----
    for ky in range(3):
        rows = slab[ky:ky + TH]                              # (TH, W+2, Cin)
        chunk = jnp.concatenate(
            [rows[:, kx:kx + W, :].reshape(TH * W, Cin) for kx in range(3)],
            axis=-1)                                         # (TH*W, 3*Cin)
        col_ref[:, ky * 3 * Cin:(ky + 1) * 3 * Cin] = chunk

    # ---- single MXU matmul: (TH*W, 9*Cin) @ (9*Cin, Cout), fp32 accumulate ----
    acc = jnp.dot(col_ref[...], w_ref[...], preferred_element_type=jnp.float32)

    # ---- epilogue in natural (TH*W, Cout) layout: bias + ReLU, free sublane split
    # to (TH, W, Cout); no lane repack. ----
    y = jnp.maximum(acc + bias_ref[...], 0.0)
    o_ref[0] = y.reshape(TH, W, Cout).astype(o_ref.dtype)


def convtrans3x3(x_nhwc, w_t, gamma, beta, running_mean, running_var,
                 eps=1e-5, tile_h=16):
    """ConvTranspose2d(16, Cout, 3, 1, 1, bias=False) + BatchNorm2d(eval) + ReLU.

    x_nhwc: (N, H, W, 16) float32
    w_t   : (16, Cout, 3, 3) PyTorch ConvTranspose2d weight layout
    """
    N, H, W, Cin = x_nhwc.shape
    Cout = w_t.shape[1]

    # ConvTranspose(k=3,s=1,p=1) == regular 3x3 cross-correlation (pad=1) with
    # spatially-flipped, in/out-swapped weights:
    #   Wc[ky, kx, ci, co] = Wt[ci, co, 2-ky, 2-kx]
    w_hwio = jnp.transpose(jnp.flip(w_t, axis=(2, 3)), (2, 3, 0, 1))   # (3,3,Cin,Cout)

    # Fold eval-mode BatchNorm scale into the weights; only a bias-add stays in-kernel.
    inv_std = gamma / jnp.sqrt(running_var + eps)                      # (Cout,)
    w_mat = (w_hwio * inv_std).reshape(9 * Cin, Cout)                  # (144, Cout)
    bias_row = (beta - running_mean * inv_std).reshape(1, Cout)        # (1, Cout)

    TH = tile_h if H % tile_h == 0 else H                              # H-tile size

    # padding=1 halo for the equivalent 3x3 conv.
    x_pad = jnp.pad(x_nhwc, ((0, 0), (1, 1), (1, 1), (0, 0)))

    out = pl.pallas_call(
        convtrans3x3_kernel,
        out_shape=jax.ShapeDtypeStruct((N, H, W, Cout), x_nhwc.dtype),
        grid_spec=pltpu.PrefetchScalarGridSpec(
            num_scalar_prefetch=0,
            grid=(N, H // TH),
            in_specs=[
                pl.BlockSpec((1, H + 2, W + 2, Cin), lambda n, t: (n, 0, 0, 0)),
                pl.BlockSpec((9 * Cin, Cout), lambda n, t: (0, 0)),
                pl.BlockSpec((1, Cout), lambda n, t: (0, 0)),
            ],
            out_specs=pl.BlockSpec((1, TH, W, Cout), lambda n, t: (n, t, 0, 0)),
            scratch_shapes=[pltpu.VMEM((TH * W, 9 * Cin), jnp.float32)],
        ),
        compiler_params=pltpu.CompilerParams(
            dimension_semantics=("parallel", "parallel"),
        ),
    )(x_pad, w_mat, bias_row)

    return out


if __name__ == "__main__":
    key = jax.random.PRNGKey(0)
    k_x, k_w, k_g, k_b = jax.random.split(key, 4)

    N, Cin, H, W = 2, 16, 16, 16     # Cin=16 is fixed by the module
    ch_out = 32

    # Input in PyTorch NCHW convention, converted to NHWC for the kernel.
    x_nchw = jax.random.normal(k_x, (N, Cin, H, W), dtype=jnp.float32)
    x_nhwc = jnp.transpose(x_nchw, (0, 2, 3, 1))

    # ConvTranspose2d weight, PyTorch layout (in_channels, out_channels, kH, kW).
    w_t = 0.1 * jax.random.normal(k_w, (Cin, ch_out, 3, 3), dtype=jnp.float32)

    # BatchNorm2d(ch_out) params, eval-mode running stats.
    gamma = 1.0 + 0.1 * jax.random.normal(k_g, (ch_out,), dtype=jnp.float32)
    beta = 0.1 * jax.random.normal(k_b, (ch_out,), dtype=jnp.float32)
    running_mean = jnp.zeros((ch_out,), jnp.float32)
    running_var = jnp.ones((ch_out,), jnp.float32)
    eps = 1e-5

    out = convtrans3x3(x_nhwc, w_t, gamma, beta, running_mean, running_var, eps)
    out = jax.block_until_ready(out)

    # Reference (plain JAX): equivalent conv + BN(eval) + ReLU.
    w_hwio = jnp.transpose(jnp.flip(w_t, axis=(2, 3)), (2, 3, 0, 1))
    inv_std = gamma / jnp.sqrt(running_var + eps)
    scale = inv_std.reshape(1, 1, 1, -1)
    bias = (beta - running_mean * inv_std).reshape(1, 1, 1, -1)
    ref = lax.conv_general_dilated(
        x_nhwc, w_hwio, window_strides=(1, 1), padding="SAME",
        dimension_numbers=("NHWC", "HWIO", "NHWC"),
    )
    ref = jnp.maximum(ref * scale + bias, 0.0)

    assert out.shape == (N, H, W, ch_out)
    assert jnp.max(jnp.abs(out - ref)) < 1e-4
    print("KERNEL_OK")
</pallas_src>

<mosaic_0001>
module attributes {stable_mosaic.version = 11 : i64} {
  func.func @convtrans3x3_kernel(%arg0: i32, %arg1: i32, %arg2: memref<1x18x18x16xf32, #tpu.memory_space<vmem>>, %arg3: memref<144x32xf32, #tpu.memory_space<vmem>>, %arg4: memref<1x32xf32, #tpu.memory_space<vmem>>, %arg5: memref<1x16x16x32xf32, #tpu.memory_space<vmem>>, %arg6: memref<256x144xf32, #tpu.memory_space<vmem>>) attributes {dimension_semantics = [#tpu.dimension_semantics<parallel>, #tpu.dimension_semantics<parallel>], iteration_bounds = array<i64: 2, 1>, scalar_prefetch = 0 : i64, scratch_operands = 1 : i64, tpu.core_type = #tpu.core_type<tc>, window_params = [{transform_indices = @transform_0, window_bounds = array<i64: 1, 18, 18, 16>}, {pipeline_mode = #tpu.pipeline_mode<synchronous>, transform_indices = @transform_1, window_bounds = array<i64: 144, 32>}, {pipeline_mode = #tpu.pipeline_mode<synchronous>, transform_indices = @transform_2, window_bounds = array<i64: 1, 32>}, {transform_indices = @transform_3, window_bounds = array<i64: 1, 16, 16, 32>}]} {
    %c16_i32 = arith.constant 16 : i32
    %0 = arith.muli %arg1, %c16_i32 : i32
    %1 = tpu.assume_multiple %0, 16 : i32
    %c0 = arith.constant 0 : index
    %2 = arith.index_cast %1 : i32 to index
    %c0_0 = arith.constant 0 : index
    %c0_1 = arith.constant 0 : index
    %3 = vector.load %arg2[%c0, %2, %c0_0, %c0_1] : memref<1x18x18x16xf32, #tpu.memory_space<vmem>>, vector<1x18x18x16xf32>
    %4 = vector.shape_cast %3 : vector<1x18x18x16xf32> to vector<18x18x16xf32>
    %5 = vector.extract_strided_slice %4 {offsets = [0, 0, 0], sizes = [16, 18, 16], strides = [1, 1, 1]} : vector<18x18x16xf32> to vector<16x18x16xf32>
    %6 = vector.extract_strided_slice %5 {offsets = [0, 0, 0], sizes = [16, 16, 16], strides = [1, 1, 1]} : vector<16x18x16xf32> to vector<16x16x16xf32>
    %7 = vector.shape_cast %6 : vector<16x16x16xf32> to vector<256x16xf32>
    %8 = vector.extract_strided_slice %5 {offsets = [0, 1, 0], sizes = [16, 16, 16], strides = [1, 1, 1]} : vector<16x18x16xf32> to vector<16x16x16xf32>
    %9 = vector.shape_cast %8 : vector<16x16x16xf32> to vector<256x16xf32>
    %10 = vector.extract_strided_slice %5 {offsets = [0, 2, 0], sizes = [16, 16, 16], strides = [1, 1, 1]} : vector<16x18x16xf32> to vector<16x16x16xf32>
    %11 = vector.shape_cast %10 : vector<16x16x16xf32> to vector<256x16xf32>
    %12 = tpu.concatenate %7, %9, %11 in 1 : vector<256x16xf32>, vector<256x16xf32>, vector<256x16xf32> -> vector<256x48xf32>
    %c0_2 = arith.constant 0 : index
    %c0_3 = arith.constant 0 : index
    %13 = vector.load %arg6[%c0_2, %c0_3] : memref<256x144xf32, #tpu.memory_space<vmem>>, vector<256x48xf32>
    tpu.vector_store %arg6[%c0_2, %c0_3], %12 {strides = array<i32>} : memref<256x144xf32, #tpu.memory_space<vmem>>, vector<256x48xf32>,
    %14 = vector.extract_strided_slice %4 {offsets = [1, 0, 0], sizes = [16, 18, 16], strides = [1, 1, 1]} : vector<18x18x16xf32> to vector<16x18x16xf32>
    %15 = vector.extract_strided_slice %14 {offsets = [0, 0, 0], sizes = [16, 16, 16], strides = [1, 1, 1]} : vector<16x18x16xf32> to vector<16x16x16xf32>
    %16 = vector.shape_cast %15 : vector<16x16x16xf32> to vector<256x16xf32>
    %17 = vector.extract_strided_slice %14 {offsets = [0, 1, 0], sizes = [16, 16, 16], strides = [1, 1, 1]} : vector<16x18x16xf32> to vector<16x16x16xf32>
    %18 = vector.shape_cast %17 : vector<16x16x16xf32> to vector<256x16xf32>
    %19 = vector.extract_strided_slice %14 {offsets = [0, 2, 0], sizes = [16, 16, 16], strides = [1, 1, 1]} : vector<16x18x16xf32> to vector<16x16x16xf32>
    %20 = vector.shape_cast %19 : vector<16x16x16xf32> to vector<256x16xf32>
    %21 = tpu.concatenate %16, %18, %20 in 1 : vector<256x16xf32>, vector<256x16xf32>, vector<256x16xf32> -> vector<256x48xf32>
    %c0_4 = arith.constant 0 : index
    %c48 = arith.constant 48 : index
    %22 = vector.load %arg6[%c0_4, %c48] : memref<256x144xf32, #tpu.memory_space<vmem>>, vector<256x48xf32>
    tpu.vector_store %arg6[%c0_4, %c48], %21 {strides = array<i32>} : memref<256x144xf32, #tpu.memory_space<vmem>>, vector<256x48xf32>,
    %23 = vector.extract_strided_slice %4 {offsets = [2, 0, 0], sizes = [16, 18, 16], strides = [1, 1, 1]} : vector<18x18x16xf32> to vector<16x18x16xf32>
    %24 = vector.extract_strided_slice %23 {offsets = [0, 0, 0], sizes = [16, 16, 16], strides = [1, 1, 1]} : vector<16x18x16xf32> to vector<16x16x16xf32>
    %25 = vector.shape_cast %24 : vector<16x16x16xf32> to vector<256x16xf32>
    %26 = vector.extract_strided_slice %23 {offsets = [0, 1, 0], sizes = [16, 16, 16], strides = [1, 1, 1]} : vector<16x18x16xf32> to vector<16x16x16xf32>
    %27 = vector.shape_cast %26 : vector<16x16x16xf32> to vector<256x16xf32>
    %28 = vector.extract_strided_slice %23 {offsets = [0, 2, 0], sizes = [16, 16, 16], strides = [1, 1, 1]} : vector<16x18x16xf32> to vector<16x16x16xf32>
    %29 = vector.shape_cast %28 : vector<16x16x16xf32> to vector<256x16xf32>
    %30 = tpu.concatenate %25, %27, %29 in 1 : vector<256x16xf32>, vector<256x16xf32>, vector<256x16xf32> -> vector<256x48xf32>
    %c0_5 = arith.constant 0 : index
    %c96 = arith.constant 96 : index
    %31 = vector.load %arg6[%c0_5, %c96] : memref<256x144xf32, #tpu.memory_space<vmem>>, vector<256x48xf32>
    tpu.vector_store %arg6[%c0_5, %c96], %30 {strides = array<i32>} : memref<256x144xf32, #tpu.memory_space<vmem>>, vector<256x48xf32>,
    %c0_6 = arith.constant 0 : index
    %c0_7 = arith.constant 0 : index
    %32 = vector.load %arg6[%c0_6, %c0_7] : memref<256x144xf32, #tpu.memory_space<vmem>>, vector<256x144xf32>
    %c0_8 = arith.constant 0 : index
    %c0_9 = arith.constant 0 : index
    %33 = vector.load %arg3[%c0_8, %c0_9] : memref<144x32xf32, #tpu.memory_space<vmem>>, vector<144x32xf32>
    %cst = arith.constant dense<0.000000e+00> : vector<256x32xf32>
    %34 = tpu.matmul %32, %33, %cst {dimension_numbers = #tpu.dot_dimension_numbers<[1], [0], [0], [1], [0, 0, 1, 1], [], []>} : vector<256x144xf32>, vector<144x32xf32>, vector<256x32xf32> -> vector<256x32xf32>
    %c0_10 = arith.constant 0 : index
    %c0_11 = arith.constant 0 : index
    %35 = vector.load %arg4[%c0_10, %c0_11] : memref<1x32xf32, #tpu.memory_space<vmem>>, vector<1x32xf32>
    %36 = vector.broadcast %35 : vector<1x32xf32> to vector<256x32xf32>
    %37 = arith.addf %34, %36 : vector<256x32xf32>
    %cst_12 = arith.constant 0.000000e+00 : f32
    %38 = vector.broadcast %cst_12 : f32 to vector<256x32xf32>
    %39 = arith.maximumf %37, %38 : vector<256x32xf32>
    %40 = vector.shape_cast %39 : vector<256x32xf32> to vector<16x16x32xf32>
    %c0_13 = arith.constant 0 : index
    %c0_14 = arith.constant 0 : index
    %c0_15 = arith.constant 0 : index
    %c0_16 = arith.constant 0 : index
    %41 = vector.load %arg5[%c0_13, %c0_14, %c0_15, %c0_16] : memref<1x16x16x32xf32, #tpu.memory_space<vmem>>, vector<1x16x16x32xf32>
    %42 = vector.shape_cast %41 : vector<1x16x16x32xf32> to vector<16x16x32xf32>
    %43 = vector.shape_cast %40 : vector<16x16x32xf32> to vector<1x16x16x32xf32>
    tpu.vector_store %arg5[%c0_13, %c0_14, %c0_15, %c0_16], %43 {strides = array<i32>} : memref<1x16x16x32xf32, #tpu.memory_space<vmem>>, vector<1x16x16x32xf32>,
    return
  }
  func.func @transform_0(%arg0: i32, %arg1: i32) -> (i32, i32, i32, i32) {
    %c0_i32 = arith.constant 0 : i32
    %c0_i32_0 = arith.constant 0 : i32
    %c0_i32_1 = arith.constant 0 : i32
    %c0_i32_2 = arith.constant 0 : i32
    return %arg0, %c0_i32, %c0_i32_0, %c0_i32_1 : i32, i32, i32, i32
  }
  func.func @transform_1(%arg0: i32, %arg1: i32) -> (i32, i32) {
    %c0_i32 = arith.constant 0 : i32
    %c0_i32_0 = arith.constant 0 : i32
    %c0_i32_1 = arith.constant 0 : i32
    return %c0_i32, %c0_i32_0 : i32, i32
  }
  func.func @transform_2(%arg0: i32, %arg1: i32) -> (i32, i32) {
    %c0_i32 = arith.constant 0 : i32
    %c0_i32_0 = arith.constant 0 : i32
    %c0_i32_1 = arith.constant 0 : i32
    return %c0_i32, %c0_i32_0 : i32, i32
  }
  func.func @transform_3(%arg0: i32, %arg1: i32) -> (i32, i32, i32, i32) {
    %c0_i32 = arith.constant 0 : i32
    %c0_i32_0 = arith.constant 0 : i32
    %c0_i32_1 = arith.constant 0 : i32
    return %arg0, %arg1, %c0_i32, %c0_i32_0 : i32, i32, i32, i32
  }
}

</mosaic_0001>

<bundles_post_ra>
// kernel: tpu_custom_call.1
= control target key start
LH: loop header
LB: loop body
LE: loop exit
PB: predicated region body
PF: predicated region fallthrough
CT: control target
= control target key end

     0   :  { %8 = vsyncpa [#allocation4], 0  ;;  %s3111_s0 = inlined_call_operand.vmem [shape: f32[2,18,18,16], index: 0, kind: input, shape index: {}]   ;;  %s3112_s1 = inlined_call_operand.vmem [shape: f32[144,32], index: 1, kind: input, shape index: {}]   ;;  %s3113_s2 = inlined_call_operand.vmem [shape: f32[1,32], index: 2, kind: input, shape index: {}]   ;;  %s3114_s3 = inlined_call_operand.hbm [shape: f32[2,16,16,32], index: 3, kind: output, shape index: {}]  }
   0x1   :  { %10 = vsyncpa [#allocation4 + $0x1], 0  ;;  %s1952_s12 = smov 0   ;;  %s1954_s13 = smov 0  }
   0x2   :  { %s1956_s14 = smov 0   ;;  %s1958_s15 = smov 0  }
   0x3   :  { %s1960_s16 = smov 0   ;;  %s1962_s17 = smov 0  }
   0x4 LB: > { %s1690_s18 = sadd.s32 4294967295, %s1922_s17   ;;  %s1691_s19 = sadd.s32 4294967294, %s1922_s17   ;;  %s1922_s17 = sphi %s1962_s17, %s16_s17   ;;  %s1918_s16 = sphi %s1960_s16, %s3164_s16   ;;  %s1914_s15 = sphi %s1958_s15, %s3163_s15   ;;  %s1910_s14 = sphi %s1956_s14, %s3162_s14   ;;  %s1906_s13 = sphi %s1954_s13, %s3161_s13   ;;  %s1902_s12 = sphi %s1952_s12, %s3160_s12  }
   0x5   : > { %s28_s20 = sadd.s32 1, %s1918_s16  ;;  %s105_s21 = sadd.s32 1, %s1910_s14 }
   0x6   : > { %p30_p0 = scmp.ge.s32.totalorder %s28_s20, 2  ;;  %p115_p1 = scmp.ne.s32.totalorder %s1910_s14, %s1906_s13 }
   0x7   : > { %p116_p2 = scmp.eq.s32.totalorder %s1690_s18, 1  ;;  %p121_p3 = scmp.ne.s32.totalorder %s1906_s13, %s1902_s12 }
   0x8   : > { %s3166_s20 = smov (%p30_p0, %s28_s20), 0  ;;  %p122_p5 = scmp.eq.s32.totalorder %s1691_s19, 1 }
   0x9   : > { %p1992_p4 = por %p116_p2, %p115_p1  ;;  %s100_s23 = ssub.s32 %s1918_s16, %s3166_s20 }
   0xa   : > { %p1694_p6 = scmp.ge.s32.totalorder %s1922_s17, 1  ;;  %p103_p7 = scmp.eq.s32.totalorder %s100_s23, 0 }
   0xb   : > { %p1999_p8 = por %p122_p5, %p121_p3  ;;  %p154_p9 = scmp.lt.s32.totalorder %s1922_s17, 3 }
   0xc   : > { %s2005_s25 = scalar_select %p103_p7, %s1910_s14, %s105_s21  }
   0xd   : > { %p155_p10 = pnand %p1694_p6, %p154_p9 }
   0xf   : > { %158 = sbr.rel (%p155_p10) target bundleno = 658 (0x292), region = 32 }
  0x16   : > { %p178_p11 = scmp.lt.s32.totalorder %s1914_s15, 1  ;;  %vm289_vm0 = vcmask 1046528   ;;  %s1924_s4 = smov 16   ;;  %vm370_vm1 = vcmask 1045504   ;;  %vm643_vm2 = vcmask 130048   ;;  %vm676_vm3 = vcmask 261120  }
  0x17   : > { %s1925_s5 = smov 32   ;;  %vm709_vm4 = vcmask 392192   ;;  %s1927_s19 = smov 48   ;;  %vm899_vm5 = vcmask 785792   ;;  %vm1059_vm6 = vcmask 1048320  }
  0x18   : > { %s179_s26 = scalar_select %p178_p11, %s1914_s15, 1 }
  0x19   : > { %s1928_s21 = smov 96   ;;  %s1929_s9 = smov [#allocation3]  }
  0x1a   : > { %s1781_s27 = smul.u32 432, %s179_s26  ;;  %s1848_s10 = sshll.u32 %s1929_s9, 4  ;;  %s1849_s10 = int_to_ptr.vmem [resolvable:$false] %s1848_s10 }
  0x1b   : > { %s1850_s11 = scalar_lea.vmem %s1849_s10, 8192 }
  0x1c   : > { %s2012_s30 = scalar_lea.vmem %s3111_s0, %s1781_s27  ;;  %s1735_s27 = sshll.u32 %s1914_s15, 12 }
  0x1d   : > { %v2015_v0 = vld [vmem:[%s2012_s30 + $0xd8] sm:$0xff]  ;;  %v2018_v1 = vld [vmem:[%s2012_s30 + $0xe0] sm:$0xff]  ;;  %v2030_v7 = vld [vmem:[%s2012_s30 + $0xf0] sm:$0xff]  ;;  %s3055_s7 = scalar_lea.hbm %s3114_s3, %s1735_s27 }
  0x1e   : > { %v2021_v2 = vld [vmem:[%s2012_s30 + $0x18] sm:$0xff]  ;;  %v335_v3 = vrot.slane %v2015_v0, 1  ;;  %v336_v4 = vrot.slane %v2018_v1, 1  ;;  %v2026_v5 = vld [vmem:[%s2012_s30 + $0x20] sm:$0xff]  ;;  %v340_v10 = vrot.slane %v2030_v7, 1  ;;  %v2039_v12 = vld [vmem:[%s2012_s30 + $0x30] sm:$0xff] }
  0x1f   : > { %v295_v6 = vrot.slane %v2021_v2, 1  ;;  %v2033_v8 = vld [vmem:[%s2012_s30 + $0xf8] sm:$0xff]  ;;  %v296_v9 = vrot.slane %v2026_v5, 1  ;;  %v300_v15 = vrot.slane %v2039_v12, 1  ;;  %v381_v19 = vrot.slane %v2039_v12, 2  ;;  %v2079_v42 = vld [vmem:[%s2012_s30 + $0x140] sm:$0xff] }
  0x20   : > { %v341_v11 = vrot.slane %v2033_v8, 1  ;;  %v2042_v13 = vld [vmem:[%s2012_s30 + $0x38] sm:$0xff]  ;;  %v337_v14 = vsel %vm289_vm0, %v335_v3, %v336_v4  ;;  %v376_v22 = vrot.slane %v2021_v2, 2  ;;  %v377_v23 = vrot.slane %v2026_v5, 2  ;;  %v195_v30 = vld [vmem:[%s2012_s30 + $0x40] sm:$0x3] }
  0x21   : > { %v301_v16 = vrot.slane %v2042_v13, 1  ;;  %487 = vrot.lane.b32.xlu1 %v337_v14, %s1924_s4  ;;  %v297_v17 = vsel %vm289_vm0, %v295_v6, %v296_v9  ;;  %v382_v20 = vrot.slane %v2042_v13, 2  ;;  %v421_v25 = vrot.slane %v2030_v7, 2  ;;  %v192_v31 = vld [vmem:[%s2012_s30 + $0x28] sm:$0x3]  ;;  %v2083_v43 = vld [vmem:[%s2012_s30 + $0x80] sm:$0xff] }
  0x22   : > { %455 = vrot.lane.b32.xlu0 %v297_v17, %s1924_s4  ;;  %v342_v18 = vsel %vm289_vm0, %v340_v10, %v341_v11  ;;  %v422_v26 = vrot.slane %v2033_v8, 2  ;;  %v378_v27 = vsel %vm370_vm1, %v376_v22, %v377_v23  ;;  %v416_v28 = vrot.slane %v2015_v0, 2  ;;  %v219_v36 = vld [vmem:[%s2012_s30 + $0x100] sm:$0x3]  ;;  %v216_v37 = vld [vmem:[%s2012_s30 + $0xe8] sm:$0x3] }
  0x23   : > { %v302_v21 = vsel %vm289_vm0, %v300_v15, %v301_v16  ;;  %v383_v24 = vsel %vm370_vm1, %v381_v19, %v382_v20  ;;  %v417_v29 = vrot.slane %v2018_v1, 2  ;;  %v303_v33 = vrot.slane %v195_v30, 1  ;;  %v228_v44 = vld [vmem:[%s2012_s30 + $0x148] sm:$0x3]  ;;  %v2094_v52 = vld [vmem:[%s2012_s30 + $0x110] sm:$0xff]  ;;  %v2108_v63 = vld [vmem:[%s2012_s30 + $0x158] sm:$0xff] }
  0x24   : > { %v423_v32 = vsel %vm370_vm1, %v421_v25, %v422_v26  ;;  %v298_v35 = vrot.slane %v192_v31, 1  ;;  %v343_v39 = vrot.slane %v219_v36, 1  ;;  %v338_v41 = vrot.slane %v216_v37, 1  ;;  %v204_v45 = vld [vmem:[%s2012_s30 + $0x88] sm:$0x3]  ;;  %v2103_v58 = vld [vmem:[%s2012_s30 + $0x50] sm:$0xff] }
  0x25   : > { %491 = vrot.lane.b32.xlu1 %v342_v18, %s1924_s4  ;;  %v418_v34 = vsel %vm370_vm1, %v416_v28, %v417_v29  ;;  %v304_v38 = vsel %vm289_vm0, %v301_v16, %v303_v33  ;;  %v384_v47 = vrot.slane %v195_v30, 2  ;;  %v379_v48 = vrot.slane %v192_v31, 2  ;;  %v2091_v51 = vld [vmem:[%s2012_s30 + $0x108] sm:$0xff]  ;;  %v2124_v10 = vld [vmem:[%s2012_s30 + $0x98] sm:$0xff]  ;;  %v207_v14 = vld [vmem:[%s2012_s30 + $0xa0] sm:$0x3] }
  0x26   : > { %459 = vrot.lane.b32.xlu0 %v302_v21, %s1924_s4  ;;  %v299_v40 = vsel %vm289_vm0, %v296_v9, %v298_v35  ;;  %v344_v46 = vsel %vm289_vm0, %v341_v11, %v343_v39  ;;  %v339_v49 = vsel %vm289_vm0, %v336_v4, %v338_v41  ;;  %v424_v50 = vrot.slane %v219_v36, 2  ;;  %v2097_v53 = vld [vmem:[%s2012_s30 + $0x48] sm:$0xff]  ;;  %v231_v11 = vld [vmem:[%s2012_s30 + $0x160] sm:$0x3]  ;;  %v2166_v36 = vld [vmem:[%s2012_s30 + $0xb0] sm:$0xff] }
  0x27   : > { %v3134_v54 = vrot.slane %v2079_v42, 1  ;;  %v3133_v55 = vrot.slane %v2083_v43, 1  ;;  %v358_v56 = vrot.slane %v228_v44, 1  ;;  %v318_v57 = vrot.slane %v204_v45, 1 }
  0x28   : > { %v3128_v59 = vrot.slane %v2079_v42, 2  ;;  %v3127_v60 = vrot.slane %v2083_v43, 2  ;;  %v439_v61 = vrot.slane %v228_v44, 2  ;;  %v399_v62 = vrot.slane %v204_v45, 2 }
  0x29   : > { %555 = vrot.lane.b32.xlu1 %v383_v24, %s1925_s5  ;;  %v385_v3 = vsel %vm370_vm1, %v382_v20, %v384_v47  ;;  %v380_v4 = vsel %vm370_vm1, %v377_v23, %v379_v48  ;;  %v2116_v6 = vsel %vm289_vm0, %v3134_v54, %v358_v56  ;;  %v2121_v9 = vsel %vm289_vm0, %v3133_v55, %v318_v57  ;;  %v2192_v48 = vld [vmem:[%s2012_s30 + $0x118] sm:$0x3] }
  0x2a   : > { %551 = vrot.lane.b32.xlu0 %v378_v27, %s1925_s5  ;;  %v419_v15 = vrot.slane %v216_v37, 2  ;;  %v345_v16 = vrot.slane %v2091_v51, 1  ;;  %v2132_v17 = vsel %vm370_vm1, %v3128_v59, %v439_v61  ;;  %v2137_v18 = vsel %vm370_vm1, %v3127_v60, %v399_v62  ;;  %v234_v37 = vld [vmem:[%s2012_s30 + $0x178] sm:$0x3] }
  0x2b   : > { %v425_v19 = vsel %vm370_vm1, %v422_v26, %v424_v50  ;;  %v346_v20 = vrot.slane %v2094_v52, 1  ;;  %v305_v21 = vrot.slane %v2097_v53, 1  ;;  %v306_v22 = vrot.slane %v2103_v58, 1 }
  0x2c   : > { %v3125_v23 = vrot.slane %v2108_v63, 1  ;;  %v3121_v24 = vrot.slane %v2124_v10, 1  ;;  %v363_v25 = vrot.slane %v231_v11, 1  ;;  %v323_v27 = vrot.slane %v207_v14, 1 }
  0x2d   : > { %587 = vrot.lane.b32.xlu1 %v423_v32, %s1925_s5  ;;  %v3120_v26 = vrot.slane %v2108_v63, 2  ;;  %v3119_v28 = vrot.slane %v2124_v10, 2  ;;  %v444_v30 = vrot.slane %v231_v11, 2  ;;  %v404_v31 = vrot.slane %v207_v14, 2  ;;  %v2150_v32 = vld [vmem:[%s2012_s30 + $0x170] sm:$0xff]  ;;  %v2203_v14 = vld [vmem:[%s2012_s30 + $0x188] sm:$0xff] }
  0x2e   : > { %583 = vrot.lane.b32.xlu0 %v418_v34, %s1925_s5  ;;  %v420_v33 = vsel %vm370_vm1, %v417_v29, %v419_v15  ;;  %v2158_v34 = vsel %vm289_vm0, %v3125_v23, %v363_v25  ;;  %v2163_v35 = vsel %vm289_vm0, %v3121_v24, %v323_v27  ;;  %v426_v39 = vrot.slane %v2091_v51, 2  ;;  %v213_v25 = vld [vmem:[%s2012_s30 + $0xd0] sm:$0x3] }
  0x2f   : > { %v2175_v29 = vsel %vm370_vm1, %v3120_v26, %v444_v30  ;;  %v2180_v41 = vsel %vm370_vm1, %v3119_v28, %v404_v31  ;;  %v347_v44 = vsel %vm289_vm0, %v345_v16, %v346_v20  ;;  %v307_v45 = vsel %vm289_vm0, %v305_v21, %v306_v22  ;;  %v237_v21 = vld [vmem:[%s2012_s30 + $0x190] sm:$0x3] }
  0x30   : > { %v387_v47 = vrot.slane %v2103_v58, 2  ;;  %v3118_v50 = vrot.slane %v2150_v32, 1  ;;  %v3117_v56 = vrot.slane %v2166_v36, 1  ;;  %v368_v57 = vrot.slane %v234_v37, 1  ;;  %v189_v24 = vld [vmem:[%s2012_s30 + $0x10] sm:$0x3] }
  0x31   : > { %461 = vrot.lane.b32.xlu1 %v304_v38, %s1924_s4  ;;  %v210_v38 = vld [vmem:[%s2012_s30 + $0xb8] sm:$0x3]  ;;  %v3116_v62 = vrot.slane %v2150_v32, 2  ;;  %v293_v23 = vrot.slane %v189_v24, 1 }
  0x32   : > { %457 = vrot.lane.b32.xlu0 %v299_v40, %s1924_s4  ;;  %v427_v40 = vrot.slane %v2094_v52, 2  ;;  %v328_v61 = vrot.slane %v210_v38, 1  ;;  %v409_v11 = vrot.slane %v210_v38, 2  ;;  %v2208_v15 = vsel %vm289_vm0, %v3118_v50, %v368_v57 }
  0x33   : > { %v3124_v57 = vrot.slane %v2203_v14, 1  ;;  %v429_v50 = vrot.slane %v2192_v48, 2 }
  0x34   : > { %v2213_v16 = vsel %vm289_vm0, %v3117_v56, %v328_v61  ;;  %v428_v31 = vsel %vm370_vm1, %v426_v39, %v427_v40  ;;  %v748_v61 = vrot.slane %v237_v21, 1  ;;  %v2246_v39 = vld [vmem:[%s2012_s30 + $0x128] sm:$0xff]  ;;  %v2251_v56 = vld [vmem:[%s2012_s30 + $0x1a0] sm:$0xff] }
  0x35   : > { %493 = vrot.lane.b32.xlu1 %v344_v46, %s1924_s4  ;;  %v386_v46 = vrot.slane %v2097_v53, 2  ;;  %v430_v60 = vsel %vm370_vm1, %v427_v40, %v429_v50 }
  0x36   : > { %489 = vrot.lane.b32.xlu0 %v339_v49, %s1924_s4  ;;  %v2196_v49 = vld [vmem:[%s2012_s30 + $0x58] sm:$0x3]  ;;  %v2258_v28 = vsel %vm289_vm0, %v3124_v57, %v748_v61 }
  0x37   : > { %v308_v38 = vrot.slane %v2196_v49, 1 }
  0x39   : > { %557 = vrot.lane.b32.xlu1 %v385_v3, %s1925_s5  ;;  %v3115_v3 = vrot.slane %v2166_v36, 2 }
  0x3a   : > { %553 = vrot.lane.b32.xlu0 %v380_v4, %s1925_s5  ;;  %v449_v4 = vrot.slane %v234_v37, 2  ;;  %v348_v37 = vrot.slane %v2192_v48, 1 }
  0x3b   : > { %v2229_v30 = vsel %vm370_vm1, %v3115_v3, %v409_v11  ;;  %v3123_v11 = vrot.slane %v2203_v14, 2  ;;  %v753_v3 = vrot.slane %v237_v21, 2  ;;  %v2266_v21 = vld [vmem:[%s2012_s30 + $0x8] sm:$0xff] }
  0x3c   : > { %v2224_v27 = vsel %vm370_vm1, %v3116_v62, %v449_v4  ;;  %v333_v4 = vrot.slane %v213_v25, 1  ;;  %v414_v62 = vrot.slane %v213_v25, 2  ;;  %v240_v25 = vld [vmem:[%s2012_s30 + $0x1a8] sm:$0x3]  ;;  %v349_v48 = vsel %vm289_vm0, %v346_v20, %v348_v37  ;;  %v2291_v37 = vld [vmem:[%s2012_s30 + $0x60] sm:$0xff] }
  0x3d   : > { %589 = vrot.lane.b32.xlu1 %v425_v19, %s1925_s5  ;;  %v2216_v19 = vld [vmem:[%s2012_s30 + $0xc8] sm:$0xff]  ;;  %v2278_v61 = vsel %vm370_vm1, %v3123_v11, %v753_v3  ;;  %v351_v20 = vrot.slane %v2246_v39, 1  ;;  %v3131_v3 = vrot.slane %v2251_v56, 1  ;;  %v3132_v11 = vrot.slane %v2266_v21, 1 }
  0x3e   : > { %585 = vrot.lane.b32.xlu0 %v420_v33, %s1925_s5  ;;  %v388_v33 = vsel %vm370_vm1, %v386_v46, %v387_v47  ;;  %v3126_v46 = vrot.slane %v2216_v19, 2  ;;  %v938_v57 = vrot.slane %v240_v25, 1 }
  0x41   : > { %495 = vrot.lane.b32.xlu1 %v347_v44, %s1924_s4  ;;  %v2241_v44 = vld [vmem:[%s2012_s30 + $0x120] sm:$0xff] }
  0x42   : > { %463 = vrot.lane.b32.xlu0 %v307_v45, %s1924_s4  ;;  %v3122_v45 = vrot.slane %v2216_v19, 1 }
  0x44   : > { %v2263_v26 = vsel %vm289_vm0, %v3122_v45, %v333_v4  ;;  %v2283_v4 = vsel %vm370_vm1, %v3126_v46, %v414_v62  ;;  %v350_v45 = vrot.slane %v2241_v44, 1  ;;  %v3129_v62 = vrot.slane %v2251_v56, 2 }
  0x45   : > { %591 = vrot.lane.b32.xlu1 %v428_v31, %s1925_s5  ;;  %v389_v31 = vrot.slane %v2196_v49, 2  ;;  %v2294_v49 = vld [vmem:[%s2012_s30 + $0x68] sm:$0xff]  ;;  %v374_v46 = vrot.slane %v189_v24, 2  ;;  %v2316_v24 = vsel %vm289_vm0, %v3132_v11, %v293_v23 }
  0x46   : > { %559 = vrot.lane.b32.xlu0 %v388_v33, %s1925_s5  ;;  %v309_v33 = vsel %vm289_vm0, %v306_v22, %v308_v38  ;;  %3138 = vst [vmem:[#allocation6_spill] sm:$0xff] %v2294_v49  ;;  %v3130_v22 = vrot.slane %v2266_v21, 2  ;;  %v943_v38 = vrot.slane %v240_v25, 2  ;;  %v310_v25 = vrot.slane %v2291_v37, 1 }
  0x47   : > { %v390_v59 = vsel %vm370_vm1, %v387_v47, %v389_v31  ;;  %v311_v40 = vrot.slane %v2294_v49, 1  ;;  %v352_v23 = vsel %vm289_vm0, %v350_v45, %v351_v20  ;;  %v432_v31 = vrot.slane %v2246_v39, 2 }
  0x48   : > { %v2323_v50 = vsel %vm370_vm1, %v3129_v62, %v943_v38  ;;  %v2328_v47 = vsel %vm370_vm1, %v3130_v22, %v374_v46  ;;  %v391_v38 = vrot.slane %v2291_v37, 2  ;;  %v392_v62 = vrot.slane %v2294_v49, 2  ;;  %v225_v46 = vld [vmem:[%s2012_s30 + $0x130] sm:$0x3]  ;;  %v2349_v49 = vld [vmem:[%s2012_s30 + $0x138] sm:$0xff] }
  0x49   : > { %497 = vrot.lane.b32.xlu1 %v349_v48, %s1924_s4  ;;  %v2311_v48 = vsel %vm289_vm0, %v3131_v3, %v938_v57  ;;  %v431_v57 = vrot.slane %v2241_v44, 2  ;;  %v201_v22 = vld [vmem:[%s2012_s30 + $0x70] sm:$0x3]  ;;  %v434_v11 = vrot.slane %v225_v46, 2 }
  0x4a   : > { %465 = vrot.lane.b32.xlu0 %v309_v33, %s1924_s4  ;;  %v312_v33 = vsel %vm289_vm0, %v310_v25, %v311_v40  ;;  %v393_v45 = vsel %vm370_vm1, %v391_v38, %v392_v62  ;;  %v313_v3 = vrot.slane %v201_v22, 1  ;;  %v394_v54 = vrot.slane %v201_v22, 2 }
  0x4c   : > { %v314_v55 = vsel %vm289_vm0, %v311_v40, %v313_v3  ;;  %v3139_v3 = vrot.slane %v2079_v42, 1 }
  0x4d   : > { %593 = vrot.lane.b32.xlu1 %v430_v60, %s1925_s5  ;;  %v353_v60 = vrot.slane %v225_v46, 1  ;;  %v3142_v46 = vrot.slane %v2083_v43, 2 }
  0x4e   : > { %561 = vrot.lane.b32.xlu0 %v390_v59, %s1925_s5  ;;  %v433_v59 = vsel %vm370_vm1, %v431_v57, %v432_v31  ;;  %v435_v57 = vsel %vm370_vm1, %v432_v31, %v434_v11  ;;  %v3140_v11 = vrot.slane %v2083_v43, 1 }
  0x4f   : > { %v354_v25 = vsel %vm289_vm0, %v351_v20, %v353_v60  ;;  %v395_v20 = vsel %vm370_vm1, %v392_v62, %v394_v54  ;;  %v3141_v54 = vrot.slane %v2079_v42, 2  ;;  %v2381_v60 = vld [vmem:[%s2012_s30 + $0x150] sm:$0xff] }
  0x51   : > { %499 = vrot.lane.b32.xlu1 %v352_v23, %s1924_s4  ;;  %v2352_v23 = vld [vmem:[%s2012_s30 + $0x78] sm:$0xff] }
  0x52   : > { %467 = vrot.lane.b32.xlu0 %v312_v33, %s1924_s4  ;;  %v355_v33 = vrot.slane %v2349_v49, 1  ;;  %v315_v38 = vrot.slane %v2352_v23, 1  ;;  %v396_v31 = vrot.slane %v2352_v23, 2 }
  0x54   : > { %v357_v22 = vsel %vm289_vm0, %v355_v33, %v3139_v3  ;;  %v317_v40 = vsel %vm289_vm0, %v315_v38, %v3140_v11  ;;  %v3143_v33 = vrot.slane %v2108_v63, 1  ;;  %v3144_v38 = vrot.slane %v2124_v10, 1  ;;  %v2415_v11 = vld [vmem:[%s2012_s30 + $0x168] sm:$0xff] }
  0x55   : > { %595 = vrot.lane.b32.xlu1 %v433_v59, %s1925_s5  ;;  %v398_v59 = vsel %vm370_vm1, %v396_v31, %v3142_v46  ;;  %v365_v31 = vrot.slane %v2415_v11, 1 }
  0x56   : > { %563 = vrot.lane.b32.xlu0 %v393_v45, %s1925_s5  ;;  %v2384_v45 = vld [vmem:[%s2012_s30 + $0x90] sm:$0xff] }
  0x57   : > { %v401_v3 = vrot.slane %v2384_v45, 2 }
  0x59   : > { %501 = vrot.lane.b32.xlu1 %v354_v25, %s1924_s4  ;;  %v360_v25 = vrot.slane %v2381_v60, 1 }
  0x5a   : > { %469 = vrot.lane.b32.xlu0 %v314_v55, %s1924_s4  ;;  %v436_v55 = vrot.slane %v2349_v49, 2 }
  0x5c   : > { %v438_v62 = vsel %vm370_vm1, %v436_v55, %v3141_v54 }
  0x5d   : > { %597 = vrot.lane.b32.xlu1 %v435_v57, %s1925_s5  ;;  %v320_v57 = vrot.slane %v2384_v45, 1 }
  0x5e   : > { %565 = vrot.lane.b32.xlu0 %v395_v20, %s1925_s5  ;;  %v362_v20 = vsel %vm289_vm0, %v360_v25, %v3143_v33 }
  0x61   : > { %503 = vrot.lane.b32.xlu1 %v357_v22, %s1924_s4  ;;  %v3146_v22 = vrot.slane %v2124_v10, 2 }
  0x62   : > { %471 = vrot.lane.b32.xlu0 %v317_v40, %s1924_s4  ;;  %v2418_v40 = vld [vmem:[%s2012_s30 + $0xa8] sm:$0xff] }
  0x63   : > { %v403_v55 = vsel %vm370_vm1, %v401_v3, %v3146_v22  ;;  %v325_v54 = vrot.slane %v2418_v40, 1  ;;  %v406_v25 = vrot.slane %v2418_v40, 2  ;;  %v2456_v3 = vld [vmem:[%s2012_s30 + $0x180] sm:$0xff]  ;;  %v1191_v22 = vld [vmem:[%s3112_s1 + $0x18] sm:$0xff] }
  0x65   : > { %599 = vrot.lane.b32.xlu1 %v438_v62, %s1925_s5  ;;  %v3147_v62 = vrot.slane %v2150_v32, 1 }
  0x66   : > { %567 = vrot.lane.b32.xlu0 %v398_v59, %s1925_s5  ;;  %v3148_v59 = vrot.slane %v2166_v36, 1 }
  0x67   : > { %v367_v46 = vsel %vm289_vm0, %v365_v31, %v3147_v62  ;;  %v745_v31 = vrot.slane %v2456_v3, 1  ;;  %v1192_v62 = vld [vmem:[%s3112_s1 + $0x20] sm:$0xff] }
  0x69   : > { %505 = vrot.lane.b32.xlu1 %v2116_v6, %s1924_s4  ;;  %v441_v6 = vrot.slane %v2381_v60, 2 }
  0x6a   : > { %473 = vrot.lane.b32.xlu0 %v2121_v9, %s1924_s4  ;;  %v322_v9 = vsel %vm289_vm0, %v320_v57, %v3144_v38  ;;  %v3150_v57 = vrot.slane %v2166_v36, 2 }
  0x6c   : > { %v408_v33 = vsel %vm370_vm1, %v406_v25, %v3150_v57  ;;  %v3153_v57 = vrot.slane %v2203_v14, 2 }
  0x6d   : > { %601 = vrot.lane.b32.xlu1 %v2132_v17, %s1925_s5  ;;  %v3145_v17 = vrot.slane %v2108_v63, 2 }
  0x6e   : > { %569 = vrot.lane.b32.xlu0 %v2137_v18, %s1925_s5 }
  0x6f   : > { %v443_v18 = vsel %vm370_vm1, %v441_v6, %v3145_v17  ;;  %v1189_v6 = vld [vmem:[%s3112_s1 + $0x8] sm:$0xff]  ;;  %v2460_v17 = vld [vmem:[%s2012_s30 + $0xc0] sm:$0xff] }
  0x71   : > { %507 = vrot.lane.b32.xlu1 %v362_v20, %s1924_s4  ;;  %v1188_v20 = vld [vmem:[%s3112_s1] sm:$0xff] }
  0x72   : > { %475 = vrot.lane.b32.xlu0 %v322_v9, %s1924_s4  ;;  %v1737_v38 = vpack.c.bf16 %v1189_v6, %v1188_v20  ;;  %v1926_v9 = vmov 0.0|0.0   ;;  %v3154_v6 = vrot.slane %v2216_v19, 2 }
  0x73   : > { %1736 = vmatprep.subr.bf16.mxu0 %v1926_v9  ;;  %1763 = vmatprep.subr.bf16.mxu1 %v1926_v9 }
  0x74   : > { %1738 = vmatpush1.bf16.msra.mxu0 %v1737_v38  ;;  %1772 = vmatpush1.bf16.msra.mxu1 %v1737_v38 }
  0x75   : > { %603 = vrot.lane.b32.xlu1 %v443_v18, %s1925_s5  ;;  %1739 = vmatprep.subr.bf16.mxu0 %v1926_v9  ;;  %v1190_v18 = vld [vmem:[%s3112_s1 + $0x10] sm:$0xff] }
  0x76   : > { %571 = vrot.lane.b32.xlu0 %v403_v55, %s1925_s5  ;;  %v1740_v55 = vpack.c.bf16 %v1191_v22, %v1190_v18  ;;  %1764 = vmatprep.subr.bf16.mxu1 %v1926_v9  ;;  %v1196_v22 = vld [vmem:[%s3112_s1 + $0x40] sm:$0xff] }
  0x78   : > { %1741 = vmatpush1.bf16.msra.mxu0 %v1740_v55  ;;  %1773 = vmatpush1.bf16.msra.mxu1 %v1740_v55  ;;  %v1197_v55 = vld [vmem:[%s3112_s1 + $0x48] sm:$0xff] }
  0x79   : > { %509 = vrot.lane.b32.xlu1 %v2158_v34, %s1924_s4  ;;  %v446_v34 = vrot.slane %v2415_v11, 2  ;;  %1742 = vmatprep.subr.bf16.mxu0 %v1926_v9 }
  0x7a   : > { %477 = vrot.lane.b32.xlu0 %v2163_v35, %s1924_s4  ;;  %v327_v35 = vsel %vm289_vm0, %v325_v54, %v3148_v59  ;;  %v330_v54 = vrot.slane %v2460_v17, 1  ;;  %1765 = vmatprep.subr.bf16.mxu1 %v1926_v9  ;;  %v750_v59 = vrot.slane %v2456_v3, 2 }
  0x7d   : > { %605 = vrot.lane.b32.xlu1 %v2175_v29, %s1925_s5  ;;  %v3149_v29 = vrot.slane %v2150_v32, 2 }
  0x7e   : > { %573 = vrot.lane.b32.xlu0 %v2180_v41, %s1925_s5 }
  0x7f   : > { %v448_v41 = vsel %vm370_vm1, %v446_v34, %v3149_v29  ;;  %v411_v29 = vrot.slane %v2460_v17, 2 }
  0x81   : > { %511 = vrot.lane.b32.xlu1 %v367_v46, %s1924_s4  ;;  %v3151_v46 = vrot.slane %v2203_v14, 1  ;;  %v413_v38 = vsel %vm370_vm1, %v411_v29, %v3154_v6 }
  0x82   : > { %479 = vrot.lane.b32.xlu0 %v327_v35, %s1924_s4  ;;  %v3152_v35 = vrot.slane %v2216_v19, 1 }
  0x83   : > { %v747_v34 = vsel %vm289_vm0, %v745_v31, %v3151_v46  ;;  %v1749_v31 = vpack.c.bf16 %v1197_v55, %v1196_v22  ;;  %v1198_v46 = vld [vmem:[%s3112_s1 + $0x50] sm:$0xff]  ;;  %v3156_v22 = vrot.slane %v2251_v56, 1 }
  0x84   : > { %v332_v25 = vsel %vm289_vm0, %v330_v54, %v3152_v35 }
  0x85   : > { %607 = vrot.lane.b32.xlu1 %v448_v41, %s1925_s5 }
  0x86   : > { %575 = vrot.lane.b32.xlu0 %v408_v33, %s1925_s5  ;;  %v752_v33 = vsel %vm370_vm1, %v750_v59, %v3153_v57 }
  0x89   : > { %513 = vrot.lane.b32.xlu1 %v2208_v15, %s1924_s4  ;;  %v1193_v15 = vld [vmem:[%s3112_s1 + $0x28] sm:$0xff] }
  0x8a   : > { %481 = vrot.lane.b32.xlu0 %v2213_v16, %s1924_s4  ;;  %v1743_v16 = vpack.c.bf16 %v1193_v15, %v1192_v62  ;;  %v2523_v62 = vld [vmem:[%s2012_s30] sm:$0xff] }
  0x8b   : > { %v290_v35 = vrot.slane %v2523_v62, 1 }
  0x8c   : > { %1744 = vmatpush1.bf16.msra.mxu0 %v1743_v16  ;;  %1774 = vmatpush1.bf16.msra.mxu1 %v1743_v16  ;;  %v2526_v16 = vld [vmem:[%s2012_s30 + $0x198] sm:$0xff] }
  0x8d   : > { %609 = vrot.lane.b32.xlu1 %v2224_v27, %s1925_s5  ;;  %1745 = vmatprep.subr.bf16.mxu0 %v1926_v9  ;;  %v1194_v27 = vld [vmem:[%s3112_s1 + $0x30] sm:$0xff] }
  0x8e   : > { %577 = vrot.lane.b32.xlu0 %v2229_v30, %s1925_s5  ;;  %v1195_v30 = vld [vmem:[%s3112_s1 + $0x38] sm:$0xff]  ;;  %1766 = vmatprep.subr.bf16.mxu1 %v1926_v9 }
  0x8f   : > { %v1746_v41 = vpack.c.bf16 %v1195_v30, %v1194_v27  ;;  %v935_v27 = vrot.slane %v2526_v16, 1 }
  0x91   : > { %755 = vrot.lane.b32.xlu1 %v747_v34, %s1924_s4  ;;  %1747 = vmatpush1.bf16.msra.mxu0 %v1746_v41  ;;  %v1199_v34 = vld [vmem:[%s3112_s1 + $0x58] sm:$0xff]  ;;  %v937_v55 = vsel %vm289_vm0, %v935_v27, %v3156_v22 }
  0x92   : > { %483 = vrot.lane.b32.xlu0 %v332_v25, %s1924_s4  ;;  %1748 = vmatprep.subr.bf16.mxu0 %v1926_v9  ;;  %v1752_v59 = vpack.c.bf16 %v1199_v34, %v1198_v46 }
  0x93   : > { %v488_v20 = vpop.permute.xlu1 %487  ;;  %1775 = vmatpush1.bf16.msra.mxu1 %v1746_v41 }
  0x94   : > { %v456_v18 = vpop.permute.xlu0 %455  ;;  %1767 = vmatprep.subr.bf16.mxu1 %v1926_v9 }
  0x95   : > { %761 = vrot.lane.b32.xlu1 %v752_v33, %s1925_s5  ;;  %1750 = vmatpush1.bf16.msra.mxu0 %v1749_v31  ;;  %v3155_v33 = vrot.slane %v2266_v21, 1 }
  0x96   : > { %579 = vrot.lane.b32.xlu0 %v413_v38, %s1925_s5  ;;  %1751 = vmatprep.subr.bf16.mxu0 %v1926_v9  ;;  %v371_v38 = vrot.slane %v2523_v62, 2 }
  0x97   : > { %v492_v54 = vpop.permute.xlu1 %491  ;;  %1776 = vmatpush1.bf16.msra.mxu1 %v1749_v31  ;;  %v292_v6 = vsel %vm289_vm0, %v290_v35, %v3155_v33  ;;  %v940_v31 = vrot.slane %v2526_v16, 2 }
  0x98   : > { %v460_v15 = vpop.permute.xlu0 %459  ;;  %1768 = vmatprep.subr.bf16.mxu1 %v1926_v9 }
  0x99   : > { %757 = vrot.lane.b32.xlu1 %v2258_v28, %s1924_s4  ;;  %v648_v25 = vsel %vm643_vm2, %v2039_v12, %v460_v15  ;;  %1753 = vmatpush1.bf16.msra.mxu0 %v1752_v59  ;;  %v646_v28 = vsel %vm643_vm2, %v2021_v2, %v456_v18  ;;  %v1201_v12 = vld [vmem:[%s3112_s1 + $0x68] sm:$0xff] }
  0x9a   : > { %485 = vrot.lane.b32.xlu0 %v2263_v26, %s1924_s4  ;;  %1754 = vmatprep.subr.bf16.mxu0 %v1926_v9  ;;  %v1200_v26 = vld [vmem:[%s3112_s1 + $0x60] sm:$0xff] }
  0x9b   : > { %v556_v29 = vpop.permute.xlu1 %555  ;;  %1777 = vmatpush1.bf16.msra.mxu1 %v1752_v59  ;;  %v1755_v57 = vpack.c.bf16 %v1201_v12, %v1200_v26 }
  0x9c   : > { %v552_v30 = vpop.permute.xlu0 %551  ;;  %v2547_v41 = vsel %vm676_vm3, %v648_v25, %v556_v29  ;;  %1769 = vmatprep.subr.bf16.mxu1 %v1926_v9  ;;  %v3158_v25 = vrot.slane %v2251_v56, 2 }
  0x9d   : > { %763 = vrot.lane.b32.xlu1 %v2278_v61, %s1925_s5  ;;  %v679_v2 = vsel %vm676_vm3, %v646_v28, %v552_v30  ;;  %714 = vst.msk [vmem:[#allocation2 + $0x40] sm:$0xff] %vm709_vm4, %v2547_v41  ;;  %v664_v61 = vsel %vm643_vm2, %v2030_v7, %v492_v54  ;;  %1756 = vmatpush1.bf16.msra.mxu0 %v1755_v57  ;;  %v1202_v7 = vld [vmem:[%s3112_s1 + $0x70] sm:$0xff]  ;;  %v1203_v54 = vld [vmem:[%s3112_s1 + $0x78] sm:$0xff]  ;;  %v1204_v28 = vld [vmem:[%s3112_s1 + $0x80] sm:$0xff] }
  0x9e   : > { %581 = vrot.lane.b32.xlu0 %v2283_v4, %s1925_s5  ;;  %712 = vst.msk [vmem:[#allocation2 + $0x20] sm:$0xff] %vm709_vm4, %v679_v2  ;;  %v662_v4 = vsel %vm643_vm2, %v2015_v0, %v488_v20  ;;  %1757 = vmatprep.subr.bf16.mxu0 %v1926_v9  ;;  %v1758_v0 = vpack.c.bf16 %v1203_v54, %v1202_v7  ;;  %v3157_v20 = vrot.slane %v2266_v21, 2  ;;  %v1205_v30 = vld [vmem:[%s3112_s1 + $0x88] sm:$0xff] }
  0x9f   : > { %v588_v18 = vpop.permute.xlu1 %587  ;;  %1778 = vmatpush1.bf16.msra.mxu1 %v1755_v57  ;;  %v942_v29 = vsel %vm370_vm1, %v940_v31, %v3158_v25  ;;  %v1761_v26 = vpack.c.bf16 %v1205_v30, %v1204_v28 }
  0xa0   : > { %v584_v15 = vpop.permute.xlu0 %583  ;;  %v2578_v46 = vsel %vm676_vm3, %v664_v61, %v588_v18  ;;  %1770 = vmatprep.subr.bf16.mxu1 %v1926_v9  ;;  %v373_v59 = vsel %vm370_vm1, %v371_v38, %v3157_v20 }
  0xa1   : > { %451 = vrot.lane.b32.xlu1 %v292_v6, %s1924_s4  ;;  %v2589_v34 = vsel %vm676_vm3, %v662_v4, %v584_v15  ;;  %730 = vst.msk [vmem:[#allocation2 + $0x140] sm:$0xff] %vm709_vm4, %v2578_v46  ;;  %1759 = vmatpush1.bf16.msra.mxu0 %v1758_v0 }
  0xa2   : > { %945 = vrot.lane.b32.xlu0 %v937_v55, %s1924_s4  ;;  %728 = vst.msk [vmem:[#allocation2 + $0x120] sm:$0xff] %vm709_vm4, %v2589_v34  ;;  %1760 = vmatprep.subr.bf16.mxu0 %v1926_v9 }
  0xa3   : > { %v462_v35 = vpop.permute.xlu1 %461  ;;  %1779 = vmatpush1.bf16.msra.mxu1 %v1758_v0 }
  0xa4   : > { %v458_v27 = vpop.permute.xlu0 %457  ;;  %1771 = vmatprep.subr.bf16.mxu1 %v1926_v9  ;;  %v649_v33 = vsel %vm643_vm2, %v2042_v13, %v462_v35 }
  0xa5   : > { %547 = vrot.lane.b32.xlu1 %v373_v59, %s1925_s5  ;;  %1762 = vmatpush1.bf16.msra.mxu0 %v1761_v26  ;;  %v647_v38 = vsel %vm643_vm2, %v2026_v5, %v458_v27 }
  0xa6   : > { %951 = vrot.lane.b32.xlu0 %v942_v29, %s1925_s5 }
  0xa7   : > { %v494_v12 = vpop.permute.xlu1 %493  ;;  %1780 = vmatpush1.bf16.msra.mxu1 %v1761_v26 }
  0xa8   : > { %v490_v57 = vpop.permute.xlu0 %489  ;;  %v665_v13 = vsel %vm643_vm2, %v2033_v8, %v494_v12  ;;  %v3159_v12 = vld [vmem:[#allocation6_spill] sm:$0xff] }
  0xa9   : > { %835 = vrot.lane.b32.xlu1 %v2589_v34, %s1927_s19 }
  0xaa   : > { %803 = vrot.lane.b32.xlu0 %v679_v2, %s1927_s19  ;;  %v663_v2 = vsel %vm643_vm2, %v2018_v1, %v490_v57 }
  0xab   : > { %v558_v6 = vpop.permute.xlu1 %557 }
  0xac   : > { %v554_v9 = vpop.permute.xlu0 %553  ;;  %v682_v61 = vsel %vm676_vm3, %v649_v33, %v558_v6 }
  0xad   : > { %963 = vrot.lane.b32.xlu1 %v2547_v41, %s1928_s21  ;;  %v680_v18 = vsel %vm676_vm3, %v647_v38, %v554_v9  ;;  %715 = vst.msk [vmem:[#allocation2 + $0x50] sm:$0xff] %vm709_vm4, %v682_v61 }
  0xae   : > { %947 = vrot.lane.b32.xlu0 %v2311_v48, %s1924_s4  ;;  %713 = vst.msk [vmem:[#allocation2 + $0x30] sm:$0xff] %vm709_vm4, %v680_v18 }
  0xaf   : > { %v590_v5 = vpop.permute.xlu1 %589 }
  0xb0   : > { %v586_v22 = vpop.permute.xlu0 %585  ;;  %v698_v55 = vsel %vm676_vm3, %v665_v13, %v590_v5 }
  0xb1   : > { %453 = vrot.lane.b32.xlu1 %v2316_v24, %s1924_s4  ;;  %v2636_v31 = vsel %vm676_vm3, %v663_v2, %v586_v22  ;;  %731 = vst.msk [vmem:[#allocation2 + $0x150] sm:$0xff] %vm709_vm4, %v698_v55  ;;  %s175_s4 = sand.u32 1, %s1906_s13  }
  0xb2   : > { %995 = vrot.lane.b32.xlu0 %v2578_v46, %s1928_s21  ;;  %729 = vst.msk [vmem:[#allocation2 + $0x130] sm:$0xff] %vm709_vm4, %v2636_v31  ;;  %s1695_s30 = sshll.u32 %s175_s4, 8  ;;  %s3065_s15 = scalar_lea.sflag [#allocation4], %s175_s4 }
  0xb3   : > { %v496_v8 = vpop.permute.xlu1 %495  ;;  %s2957_s26 = scalar_lea.vmem [#allocation3], %s1695_s30 }
  0xb4   : > { %v464_v48 = vpop.permute.xlu0 %463  ;;  %v666_v1 = vsel %vm643_vm2, %v2091_v51, %v496_v8  ;;  %s1615_s28 = sshll.u32 %s2957_s26, 4  ;;  %s3057_s28 = int_to_ptr.vmem [resolvable:$true] %s1615_s28 }
  0xb5   : > { %549 = vrot.lane.b32.xlu1 %v2328_v47, %s1925_s5  ;;  %v650_v4 = vsel %vm643_vm2, %v2097_v53, %v464_v48  ;;  %s1844_s8 = scalar_lea.vmem %s3057_s28, 4096  ;;  %p1851_p1 = scmp.lt.s32.totalorder %s3057_s28, %s1849_s10 }
  0xb6   : > { %953 = vrot.lane.b32.xlu0 %v2323_v50, %s1925_s5  ;;  %p1845_p12 = scmp.ne.s32.totalorder %s3057_s28, %s1844_s8  ;;  %p1852_p2 = scmp.lt.s32.totalorder %s1850_s11, %s1844_s8 }
  0xb7   : > { %v592_v24 = vpop.permute.xlu1 %591 }
  0xb8   : > { %v560_v15 = vpop.permute.xlu0 %559  ;;  %v699_v7 = vsel %vm676_vm3, %v666_v1, %v592_v24  ;;  %p1846_p13 = pnand %p1845_p12, %p1992_p4  ;;  %p1853_p3 = por %p1852_p2, %p1851_p1 }
  0xb9   : > { %837 = vrot.lane.b32.xlu1 %v2636_v31, %s1927_s19  ;;  %v683_v54 = vsel %vm676_vm3, %v650_v4, %v560_v15  ;;  %732 = vst.msk [vmem:[#allocation2 + $0x160] sm:$0xff] %vm709_vm4, %v699_v7 }
  0xba   : > { %805 = vrot.lane.b32.xlu0 %v680_v18, %s1927_s19  ;;  %716 = vst.msk [vmem:[#allocation2 + $0x60] sm:$0xff] %vm709_vm4, %v683_v54  ;;  %p1847_p0 = pneg %p1846_p13 }
  0xbb   : > { %v498_v50 = vpop.permute.xlu1 %497 }
  0xbc   : > { %v466_v51 = vpop.permute.xlu0 %465  ;;  %v667_v53 = vsel %vm643_vm2, %v2094_v52, %v498_v50  ;;  %p1854_p5 = pnand %p1853_p3, %p1847_p0 }
  0xbd   : > { %997 = vrot.lane.b32.xlu1 %v698_v55, %s1928_s21  ;;  %v651_v0 = vsel %vm643_vm2, %v2103_v58, %v466_v51 }
  0xbe   : > { %965 = vrot.lane.b32.xlu0 %v682_v61, %s1928_s21 }
  0xbf   : > { %v594_v47 = vpop.permute.xlu1 %593 }
  0xc0   : > { %v562_v20 = vpop.permute.xlu0 %561  ;;  %v700_v59 = vsel %vm676_vm3, %v667_v53, %v594_v47 }
  0xc1   : > { %839 = vrot.lane.b32.xlu1 %v2578_v46, %s1927_s19  ;;  %v684_v35 = vsel %vm676_vm3, %v651_v0, %v562_v20  ;;  %733 = vst.msk [vmem:[#allocation2 + $0x170] sm:$0xff] %vm709_vm4, %v700_v59 }
  0xc2   : > { %807 = vrot.lane.b32.xlu0 %v2547_v41, %s1927_s19  ;;  %717 = vst.msk [vmem:[#allocation2 + $0x70] sm:$0xff] %vm709_vm4, %v684_v35 }
  0xc3   : > { %v500_v52 = vpop.permute.xlu1 %499 }
  0xc4   : > { %v468_v25 = vpop.permute.xlu0 %467  ;;  %v668_v58 = vsel %vm643_vm2, %v2241_v44, %v500_v52 }
  0xc5   : > { %999 = vrot.lane.b32.xlu1 %v699_v7, %s1928_s21  ;;  %v652_v46 = vsel %vm643_vm2, %v2291_v37, %v468_v25 }
  0xc6   : > { %967 = vrot.lane.b32.xlu0 %v683_v54, %s1928_s21 }
  0xc7   : > { %v596_v29 = vpop.permute.xlu1 %595 }
  0xc8   : > { %v564_v27 = vpop.permute.xlu0 %563  ;;  %v701_v28 = vsel %vm676_vm3, %v668_v58, %v596_v29 }
  0xc9   : > { %841 = vrot.lane.b32.xlu1 %v698_v55, %s1927_s19  ;;  %v685_v41 = vsel %vm676_vm3, %v652_v46, %v564_v27  ;;  %734 = vst.msk [vmem:[#allocation2 + $0x180] sm:$0xff] %vm709_vm4, %v701_v28 }
  0xca   : > { %809 = vrot.lane.b32.xlu0 %v682_v61, %s1927_s19  ;;  %718 = vst.msk [vmem:[#allocation2 + $0x80] sm:$0xff] %vm709_vm4, %v685_v41 }
  0xcb   : > { %v502_v30 = vpop.permute.xlu1 %501 }
  0xcc   : > { %v470_v26 = vpop.permute.xlu0 %469  ;;  %v669_v44 = vsel %vm643_vm2, %v2246_v39, %v502_v30 }
  0xcd   : > { %1001 = vrot.lane.b32.xlu1 %v700_v59, %s1928_s21  ;;  %v653_v57 = vsel %vm643_vm2, %v3159_v12, %v470_v26 }
  0xce   : > { %969 = vrot.lane.b32.xlu0 %v684_v35, %s1928_s21 }
  0xcf   : > { %v598_v37 = vpop.permute.xlu1 %597 }
  0xd0   : > { %v566_v33 = vpop.permute.xlu0 %565  ;;  %v702_v6 = vsel %vm676_vm3, %v669_v44, %v598_v37 }
  0xd1   : > { %843 = vrot.lane.b32.xlu1 %v699_v7, %s1927_s19  ;;  %v686_v38 = vsel %vm676_vm3, %v653_v57, %v566_v33  ;;  %735 = vst.msk [vmem:[#allocation2 + $0x190] sm:$0xff] %vm709_vm4, %v702_v6 }
  0xd2   : > { %811 = vrot.lane.b32.xlu0 %v683_v54, %s1927_s19  ;;  %719 = vst.msk [vmem:[#allocation2 + $0x90] sm:$0xff] %vm709_vm4, %v686_v38 }
  0xd3   : > { %v504_v9 = vpop.permute.xlu1 %503 }
  0xd4   : > { %v472_v61 = vpop.permute.xlu0 %471  ;;  %v670_v39 = vsel %vm643_vm2, %v2349_v49, %v504_v9 }
  0xd5   : > { %1003 = vrot.lane.b32.xlu1 %v701_v28, %s1928_s21  ;;  %v654_v13 = vsel %vm643_vm2, %v2352_v23, %v472_v61 }
  0xd6   : > { %971 = vrot.lane.b32.xlu0 %v685_v41, %s1928_s21 }
  0xd7   : > { %v600_v18 = vpop.permute.xlu1 %599 }
  0xd8   : > { %v703_v5 = vsel %vm676_vm3, %v670_v39, %v600_v18  ;;  %v568_v2 = vpop.permute.xlu0 %567 }
  0xd9   : > { %736 = vst.msk [vmem:[#allocation2 + $0x1a0] sm:$0xff] %vm709_vm4, %v703_v5  ;;  %v687_v22 = vsel %vm676_vm3, %v654_v13, %v568_v2  ;;  %845 = vrot.lane.b32.xlu1 %v700_v59, %s1927_s19 }
  0xda   : > { %720 = vst.msk [vmem:[#allocation2 + $0xa0] sm:$0xff] %vm709_vm4, %v687_v22  ;;  %813 = vrot.lane.b32.xlu0 %v684_v35, %s1927_s19 }
  0xdb   : > { %v506_v55 = vpop.permute.xlu1 %505 }
  0xdc   : > { %v474_v8 = vpop.permute.xlu0 %473  ;;  %v671_v49 = vsel %vm643_vm2, %v2079_v42, %v506_v55 }
  0xdd   : > { %1005 = vrot.lane.b32.xlu1 %v702_v6, %s1928_s21  ;;  %v655_v48 = vsel %vm643_vm2, %v2083_v43, %v474_v8 }
  0xde   : > { %973 = vrot.lane.b32.xlu0 %v686_v38, %s1928_s21 }
  0xdf   : > { %v602_v23 = vpop.permute.xlu1 %601 }
  0xe0   : > { %v704_v1 = vsel %vm676_vm3, %v671_v49, %v602_v23  ;;  %v570_v24 = vpop.permute.xlu0 %569 }
  0xe1   : > { %737 = vst.msk [vmem:[#allocation2 + $0x1b0] sm:$0xff] %vm709_vm4, %v704_v1  ;;  %v688_v4 = vsel %vm676_vm3, %v655_v48, %v570_v24  ;;  %847 = vrot.lane.b32.xlu1 %v701_v28, %s1927_s19 }
  0xe2   : > { %721 = vst.msk [vmem:[#allocation2 + $0xb0] sm:$0xff] %vm709_vm4, %v688_v4  ;;  %815 = vrot.lane.b32.xlu0 %v685_v41, %s1927_s19 }
  0xe3   : > { %v508_v15 = vpop.permute.xlu1 %507 }
  0xe4   : > { %v476_v7 = vpop.permute.xlu0 %475  ;;  %v672_v42 = vsel %vm643_vm2, %v2381_v60, %v508_v15 }
  0xe5   : > { %1007 = vrot.lane.b32.xlu1 %v703_v5, %s1928_s21  ;;  %v656_v54 = vsel %vm643_vm2, %v2384_v45, %v476_v7 }
  0xe6   : > { %975 = vrot.lane.b32.xlu0 %v687_v22, %s1928_s21 }
  0xe7   : > { %v604_v43 = vpop.permute.xlu1 %603 }
  0xe8   : > { %v705_v50 = vsel %vm676_vm3, %v672_v42, %v604_v43  ;;  %v572_v51 = vpop.permute.xlu0 %571 }
  0xe9   : > { %738 = vst.msk [vmem:[#allocation2 + $0x1c0] sm:$0xff] %vm709_vm4, %v705_v50  ;;  %v689_v53 = vsel %vm676_vm3, %v656_v54, %v572_v51  ;;  %849 = vrot.lane.b32.xlu1 %v702_v6, %s1927_s19 }
  0xea   : > { %722 = vst.msk [vmem:[#allocation2 + $0xc0] sm:$0xff] %vm709_vm4, %v689_v53  ;;  %817 = vrot.lane.b32.xlu0 %v686_v38, %s1927_s19 }
  0xeb   : > { %v510_v47 = vpop.permute.xlu1 %509 }
  0xec   : > { %v478_v0 = vpop.permute.xlu0 %477  ;;  %v673_v60 = vsel %vm643_vm2, %v2108_v63, %v510_v47 }
  0xed   : > { %1009 = vrot.lane.b32.xlu1 %v704_v1, %s1928_s21  ;;  %v657_v20 = vsel %vm643_vm2, %v2124_v10, %v478_v0 }
  0xee   : > { %977 = vrot.lane.b32.xlu0 %v688_v4, %s1928_s21 }
  0xef   : > { %v606_v45 = vpop.permute.xlu1 %605 }
  0xf0   : > { %v706_v59 = vsel %vm676_vm3, %v673_v60, %v606_v45  ;;  %v574_v35 = vpop.permute.xlu0 %573 }
  0xf1   : > { %739 = vst.msk [vmem:[#allocation2 + $0x1d0] sm:$0xff] %vm709_vm4, %v706_v59  ;;  %v690_v52 = vsel %vm676_vm3, %v657_v20, %v574_v35  ;;  %851 = vrot.lane.b32.xlu1 %v703_v5, %s1927_s19 }
  0xf2   : > { %723 = vst.msk [vmem:[#allocation2 + $0xd0] sm:$0xff] %vm709_vm4, %v690_v52  ;;  %819 = vrot.lane.b32.xlu0 %v687_v22, %s1927_s19 }
  0xf3   : > { %v512_v25 = vpop.permute.xlu1 %511 }
  0xf4   : > { %v480_v58 = vpop.permute.xlu0 %479  ;;  %v674_v63 = vsel %vm643_vm2, %v2415_v11, %v512_v25 }
  0xf5   : > { %1011 = vrot.lane.b32.xlu1 %v705_v50, %s1928_s21  ;;  %v658_v29 = vsel %vm643_vm2, %v2418_v40, %v480_v58 }
  0xf6   : > { %979 = vrot.lane.b32.xlu0 %v689_v53, %s1928_s21 }
  0xf7   : > { %v608_v10 = vpop.permute.xlu1 %607 }
  0xf8   : > { %v707_v46 = vsel %vm676_vm3, %v674_v63, %v608_v10  ;;  %v576_v27 = vpop.permute.xlu0 %575 }
  0xf9   : > { %740 = vst.msk [vmem:[#allocation2 + $0x1e0] sm:$0xff] %vm709_vm4, %v707_v46  ;;  %v691_v28 = vsel %vm676_vm3, %v658_v29, %v576_v27  ;;  %853 = vrot.lane.b32.xlu1 %v704_v1, %s1927_s19 }
  0xfa   : > { %724 = vst.msk [vmem:[#allocation2 + $0xe0] sm:$0xff] %vm709_vm4, %v691_v28  ;;  %821 = vrot.lane.b32.xlu0 %v688_v4, %s1927_s19 }
  0xfb   : > { %v514_v41 = vpop.permute.xlu1 %513 }
  0xfc   : > { %v482_v30 = vpop.permute.xlu0 %481  ;;  %v675_v11 = vsel %vm643_vm2, %v2150_v32, %v514_v41 }
  0xfd   : > { %1013 = vrot.lane.b32.xlu1 %v706_v59, %s1928_s21  ;;  %v659_v26 = vsel %vm643_vm2, %v2166_v36, %v482_v30 }
  0xfe   : > { %981 = vrot.lane.b32.xlu0 %v690_v52, %s1928_s21 }
  0xff   : > { %v610_v40 = vpop.permute.xlu1 %609 }
 0x100   : > { %v708_v44 = vsel %vm676_vm3, %v675_v11, %v610_v40  ;;  %v578_v37 = vpop.permute.xlu0 %577 }
 0x101   : > { %741 = vst.msk [vmem:[#allocation2 + $0x1f0] sm:$0xff] %vm709_vm4, %v708_v44  ;;  %v692_v12 = vsel %vm676_vm3, %v659_v26, %v578_v37  ;;  %855 = vrot.lane.b32.xlu1 %v705_v50, %s1927_s19 }
 0x102   : > { %725 = vst.msk [vmem:[#allocation2 + $0xf0] sm:$0xff] %vm709_vm4, %v692_v12  ;;  %823 = vrot.lane.b32.xlu0 %v689_v53, %s1927_s19 }
 0x103   : > { %v756_v57 = vpop.permute.xlu1 %755 }
 0x104   : > { %v484_v33 = vpop.permute.xlu0 %483  ;;  %v767_v5 = vsel %vm643_vm2, %v2456_v3, %v756_v57 }
 0x105   : > { %1015 = vrot.lane.b32.xlu1 %v707_v46, %s1928_s21  ;;  %v660_v36 = vsel %vm643_vm2, %v2460_v17, %v484_v33 }
 0x106   : > { %983 = vrot.lane.b32.xlu0 %v691_v28, %s1928_s21 }
 0x107   : > { %v762_v32 = vpop.permute.xlu1 %761 }
 0x108   : > { %v580_v6 = vpop.permute.xlu0 %579  ;;  %v769_v22 = vsel %vm676_vm3, %v767_v5, %v762_v32 }
 0x109   : > { %v693_v38 = vsel %vm676_vm3, %v660_v36, %v580_v6  ;;  %857 = vrot.lane.b32.xlu1 %v706_v59, %s1927_s19 }
 0x10a   : > { %726 = vst.msk [vmem:[#allocation2 + $0x100] sm:$0xff] %vm709_vm4, %v693_v38  ;;  %825 = vrot.lane.b32.xlu0 %v690_v52, %s1927_s19 }
 0x10b   : > { %v758_v9 = vpop.permute.xlu1 %757 }
 0x10c   : > { %v486_v61 = vpop.permute.xlu0 %485  ;;  %v768_v3 = vsel %vm643_vm2, %v2203_v14, %v758_v9 }
 0x10d   : > { %1017 = vrot.lane.b32.xlu1 %v708_v44, %s1928_s21  ;;  %v661_v18 = vsel %vm643_vm2, %v2216_v19, %v486_v61 }
 0x10e   : > { %985 = vrot.lane.b32.xlu0 %v692_v12, %s1928_s21 }
 0x10f   : > { %v764_v39 = vpop.permute.xlu1 %763 }
 0x110   : > { %v582_v17 = vpop.permute.xlu0 %581  ;;  %v770_v1 = vsel %vm676_vm3, %v768_v3, %v764_v39 }
 0x111   : > { %v694_v13 = vsel %vm676_vm3, %v661_v18, %v582_v17  ;;  %859 = vrot.lane.b32.xlu1 %v707_v46, %s1927_s19 }
 0x112   : > { %727 = vst.msk [vmem:[#allocation2 + $0x110] sm:$0xff] %vm709_vm4, %v694_v13  ;;  %827 = vrot.lane.b32.xlu0 %v691_v28, %s1927_s19 }
 0x113   : > { %v452_v2 = vpop.permute.xlu1 %451 }
 0x114   : > { %v946_v55 = vpop.permute.xlu0 %945  ;;  %v644_v19 = vsel %vm643_vm2, %v2523_v62, %v452_v2 }
 0x115   : > { %1019 = vrot.lane.b32.xlu1 %v769_v22, %s1928_s21  ;;  %v957_v14 = vsel %vm643_vm2, %v2526_v16, %v946_v55 }
 0x116   : > { %987 = vrot.lane.b32.xlu0 %v693_v38, %s1928_s21 }
 0x117   : > { %v548_v8 = vpop.permute.xlu1 %547 }
 0x118   : > { %v952_v49 = vpop.permute.xlu0 %951  ;;  %v677_v23 = vsel %vm676_vm3, %v644_v19, %v548_v8 }
 0x119   : > { %710 = vst.msk [vmem:[#allocation2] sm:$0xff] %vm709_vm4, %v677_v23  ;;  %861 = vrot.lane.b32.xlu1 %v708_v44, %s1927_s19  ;;  %v959_v7 = vsel %vm676_vm3, %v957_v14, %v952_v49 }
 0x11a   : > { %829 = vrot.lane.b32.xlu0 %v692_v12, %s1927_s19 }
 0x11b   : > { %v836_v48 = vpop.permute.xlu1 %835 }
 0x11c   : > { %v804_v24 = vpop.permute.xlu0 %803  ;;  %916 = vst.msk [vmem:[#allocation2 + $0x100] sm:$0xff] %vm899_vm5, %v836_v48 }
 0x11d   : > { %900 = vst.msk [vmem:[#allocation2] sm:$0xff] %vm899_vm5, %v804_v24  ;;  %1021 = vrot.lane.b32.xlu1 %v770_v1, %s1928_s21 }
 0x11e   : > { %989 = vrot.lane.b32.xlu0 %v694_v13, %s1928_s21 }
 0x11f   : > { %v964_v62 = vpop.permute.xlu1 %963 }
 0x120   : > { %v948_v4 = vpop.permute.xlu0 %947  ;;  %1060 = vst.msk [vmem:[#allocation2] sm:$0xff] %vm1059_vm6, %v964_v62 }
 0x121   : > { %1061 = vst.msk [vmem:[#allocation2 + $0x8] sm:$0xff] %vm643_vm2, %v964_v62  ;;  %863 = vrot.lane.b32.xlu1 %v769_v22, %s1927_s19 }
 0x122   : > { %831 = vrot.lane.b32.xlu0 %v693_v38, %s1927_s19 }
 0x123   : > { %v454_v15 = vpop.permute.xlu1 %453 }
 0x124   : > { %v996_v42 = vpop.permute.xlu0 %995  ;;  %v645_v43 = vsel %vm643_vm2, %v2266_v21, %v454_v15 }
 0x125   : > { %1092 = vst.msk [vmem:[#allocation2 + $0x100] sm:$0xff] %vm1059_vm6, %v996_v42  ;;  %1023 = vrot.lane.b32.xlu1 %v959_v7, %s1928_s21 }
 0x126   : > { %1093 = vst.msk [vmem:[#allocation2 + $0x108] sm:$0xff] %vm643_vm2, %v996_v42  ;;  %991 = vrot.lane.b32.xlu0 %v2589_v34, %s1928_s21  ;;  %v958_v34 = vsel %vm643_vm2, %v2251_v56, %v948_v4 }
 0x127   : > { %v550_v54 = vpop.permute.xlu1 %549  ;;  %v1124_v51 = vld [vmem:[#allocation2] sm:$0xff] }
 0x128   : > { %v1125_v50 = vld [vmem:[#allocation2 + $0x8] sm:$0xff]  ;;  %v954_v16 = vpop.permute.xlu0 %953  ;;  %v678_v53 = vsel %vm676_vm3, %v645_v43, %v550_v54 }
 0x129   : > { %1698 = vmatprep.mubr.msk.f32.mxu0 %vm643_vm2, %v1125_v50  ;;  %711 = vst.msk [vmem:[#allocation2 + $0x10] sm:$0xff] %vm709_vm4, %v678_v53  ;;  %865 = vrot.lane.b32.xlu1 %v770_v1, %s1927_s19  ;;  %v960_v21 = vsel %vm676_vm3, %v958_v34, %v954_v16 }
 0x12a   : > { %1374 = vmatmul.mubr.f32.vlgmr.msra.gmra.mrb[0].mxu0 %v1124_v51  ;;  %833 = vrot.lane.b32.xlu0 %v694_v13, %s1927_s19 }
 0x12b   : > { %v838_v47 = vpop.permute.xlu1 %837 }
 0x12c   : > { %v806_v0 = vpop.permute.xlu0 %805  ;;  %917 = vst.msk [vmem:[#allocation2 + $0x110] sm:$0xff] %vm899_vm5, %v838_v47  ;;  %v1156_v45 = vld [vmem:[#allocation2 + $0x100] sm:$0xff] }
 0x12d   : > { %v1157_v60 = vld [vmem:[#allocation2 + $0x108] sm:$0xff]  ;;  %901 = vst.msk [vmem:[#allocation2 + $0x10] sm:$0xff] %vm899_vm5, %v806_v0  ;;  %1025 = vrot.lane.b32.xlu1 %v960_v21, %s1928_s21 }
 0x12e   : > { %1714 = vmatprep.mubr.msk.f32.mxu1 %vm643_vm2, %v1157_v60  ;;  %993 = vrot.lane.b32.xlu0 %v2636_v31, %s1928_s21 }
 0x12f   : > { %1454 = vmatmul.mubr.f32.vlgmr.msra.gmra.mrb[0].mxu1 %v1156_v45  ;;  %v998_v20 = vpop.permute.xlu1 %997 }
 0x130   : > { %v966_v56 = vpop.permute.xlu0 %965  ;;  %1094 = vst.msk [vmem:[#allocation2 + $0x110] sm:$0xff] %vm1059_vm6, %v998_v20 }
 0x131   : > { %1095 = vst.msk [vmem:[#allocation2 + $0x118] sm:$0xff] %vm643_vm2, %v998_v20  ;;  %1063 = vst.msk [vmem:[#allocation2 + $0x18] sm:$0xff] %vm643_vm2, %v966_v56 }
 0x132   : > { %1062 = vst.msk [vmem:[#allocation2 + $0x10] sm:$0xff] %vm1059_vm6, %v966_v56 }
 0x133   : > { %v840_v59 = vpop.permute.xlu1 %839 }
 0x134   : > { %v808_v35 = vpop.permute.xlu0 %807  ;;  %918 = vst.msk [vmem:[#allocation2 + $0x120] sm:$0xff] %vm899_vm5, %v840_v59 }
 0x135   : > { %902 = vst.msk [vmem:[#allocation2 + $0x20] sm:$0xff] %vm899_vm5, %v808_v35 }
 0x137   : > { %v1000_v52 = vpop.permute.xlu1 %999  ;;  %v1158_v31 = vld [vmem:[#allocation2 + $0x110] sm:$0xff] }
 0x138   : > { %v1159_v25 = vld [vmem:[#allocation2 + $0x118] sm:$0xff]  ;;  %v968_v58 = vpop.permute.xlu0 %967  ;;  %1096 = vst.msk [vmem:[#allocation2 + $0x120] sm:$0xff] %vm1059_vm6, %v1000_v52 }
 0x139   : > { %1097 = vst.msk [vmem:[#allocation2 + $0x128] sm:$0xff] %vm643_vm2, %v1000_v52  ;;  %v1127_v63 = vld [vmem:[#allocation2 + $0x18] sm:$0xff]  ;;  %1715 = vmatprep.mubr.msk.f32.mxu1 %vm643_vm2, %v1159_v25  ;;  %v1126_v10 = vld [vmem:[#allocation2 + $0x10] sm:$0xff]  ;;  %1065 = vst.msk [vmem:[#allocation2 + $0x28] sm:$0xff] %vm643_vm2, %v968_v58 }
 0x13a   : > { %1064 = vst.msk [vmem:[#allocation2 + $0x20] sm:$0xff] %vm1059_vm6, %v968_v58  ;;  %1699 = vmatprep.mubr.msk.f32.mxu0 %vm643_vm2, %v1127_v63  ;;  %1459 = vmatmul.mubr.f32.gmra.mrb[2].mxu1 %v1158_v31 }
 0x13b   : > { %1379 = vmatmul.mubr.f32.gmra.mrb[2].mxu0 %v1126_v10  ;;  %v842_v29 = vpop.permute.xlu1 %841 }
 0x13c   : > { %v810_v46 = vpop.permute.xlu0 %809  ;;  %919 = vst.msk [vmem:[#allocation2 + $0x130] sm:$0xff] %vm899_vm5, %v842_v29 }
 0x13d   : > { %903 = vst.msk [vmem:[#allocation2 + $0x30] sm:$0xff] %vm899_vm5, %v810_v46 }
 0x13f   : > { %v1002_v27 = vpop.permute.xlu1 %1001  ;;  %v1160_v41 = vld [vmem:[#allocation2 + $0x120] sm:$0xff] }
 0x140   : > { %v1161_v28 = vld [vmem:[#allocation2 + $0x128] sm:$0xff]  ;;  %v970_v30 = vpop.permute.xlu0 %969  ;;  %1098 = vst.msk [vmem:[#allocation2 + $0x130] sm:$0xff] %vm1059_vm6, %v1002_v27 }
 0x141   : > { %1099 = vst.msk [vmem:[#allocation2 + $0x138] sm:$0xff] %vm643_vm2, %v1002_v27  ;;  %v1129_v11 = vld [vmem:[#allocation2 + $0x28] sm:$0xff]  ;;  %1716 = vmatprep.mubr.msk.f32.mxu1 %vm643_vm2, %v1161_v28  ;;  %v1128_v40 = vld [vmem:[#allocation2 + $0x20] sm:$0xff]  ;;  %1067 = vst.msk [vmem:[#allocation2 + $0x38] sm:$0xff] %vm643_vm2, %v970_v30 }
 0x142   : > { %1066 = vst.msk [vmem:[#allocation2 + $0x30] sm:$0xff] %vm1059_vm6, %v970_v30  ;;  %1700 = vmatprep.mubr.msk.f32.mxu0 %vm643_vm2, %v1129_v11  ;;  %1464 = vmatmul.mubr.f32.gmra.mrb[4].mxu1 %v1160_v41 }
 0x143   : > { %1384 = vmatmul.mubr.f32.gmra.mrb[4].mxu0 %v1128_v40  ;;  %v844_v26 = vpop.permute.xlu1 %843 }
 0x144   : > { %v812_v44 = vpop.permute.xlu0 %811  ;;  %920 = vst.msk [vmem:[#allocation2 + $0x140] sm:$0xff] %vm899_vm5, %v844_v26 }
 0x145   : > { %904 = vst.msk [vmem:[#allocation2 + $0x40] sm:$0xff] %vm899_vm5, %v812_v44 }
 0x147   : > { %v1004_v37 = vpop.permute.xlu1 %1003  ;;  %v1162_v57 = vld [vmem:[#allocation2 + $0x130] sm:$0xff] }
 0x148   : > { %v1163_v12 = vld [vmem:[#allocation2 + $0x138] sm:$0xff]  ;;  %v972_v33 = vpop.permute.xlu0 %971  ;;  %1100 = vst.msk [vmem:[#allocation2 + $0x140] sm:$0xff] %vm1059_vm6, %v1004_v37 }
 0x149   : > { %1101 = vst.msk [vmem:[#allocation2 + $0x148] sm:$0xff] %vm643_vm2, %v1004_v37  ;;  %v1131_v32 = vld [vmem:[#allocation2 + $0x38] sm:$0xff]  ;;  %1717 = vmatprep.mubr.msk.f32.mxu1 %vm643_vm2, %v1163_v12  ;;  %v1130_v36 = vld [vmem:[#allocation2 + $0x30] sm:$0xff]  ;;  %1069 = vst.msk [vmem:[#allocation2 + $0x48] sm:$0xff] %vm643_vm2, %v972_v33 }
 0x14a   : > { %1068 = vst.msk [vmem:[#allocation2 + $0x40] sm:$0xff] %vm1059_vm6, %v972_v33  ;;  %1701 = vmatprep.mubr.msk.f32.mxu0 %vm643_vm2, %v1131_v32  ;;  %1469 = vmatmul.mubr.f32.gmra.mrb[6].mxu1 %v1162_v57 }
 0x14b   : > { %1389 = vmatmul.mubr.f32.gmra.mrb[6].mxu0 %v1130_v36  ;;  %v846_v6 = vpop.permute.xlu1 %845 }
 0x14c   : > { %v814_v38 = vpop.permute.xlu0 %813  ;;  %921 = vst.msk [vmem:[#allocation2 + $0x150] sm:$0xff] %vm899_vm5, %v846_v6 }
 0x14d   : > { %905 = vst.msk [vmem:[#allocation2 + $0x50] sm:$0xff] %vm899_vm5, %v814_v38 }
 0x14f   : > { %v1006_v9 = vpop.permute.xlu1 %1005  ;;  %v1164_v39 = vld [vmem:[#allocation2 + $0x140] sm:$0xff] }
 0x150   : > { %v1165_v61 = vld [vmem:[#allocation2 + $0x148] sm:$0xff]  ;;  %v974_v18 = vpop.permute.xlu0 %973  ;;  %1102 = vst.msk [vmem:[#allocation2 + $0x150] sm:$0xff] %vm1059_vm6, %v1006_v9 }
 0x151   : > { %1103 = vst.msk [vmem:[#allocation2 + $0x158] sm:$0xff] %vm643_vm2, %v1006_v9  ;;  %v1133_v17 = vld [vmem:[#allocation2 + $0x48] sm:$0xff]  ;;  %1718 = vmatprep.mubr.msk.f32.mxu1 %vm643_vm2, %v1165_v61  ;;  %v1132_v13 = vld [vmem:[#allocation2 + $0x40] sm:$0xff]  ;;  %1071 = vst.msk [vmem:[#allocation2 + $0x58] sm:$0xff] %vm643_vm2, %v974_v18 }
 0x152   : > { %1070 = vst.msk [vmem:[#allocation2 + $0x50] sm:$0xff] %vm1059_vm6, %v974_v18  ;;  %1702 = vmatprep.mubr.msk.f32.mxu0 %vm643_vm2, %v1133_v17  ;;  %1474 = vmatmul.mubr.f32.gmra.mrb[8].mxu1 %v1164_v39 }
 0x153   : > { %1394 = vmatmul.mubr.f32.gmra.mrb[8].mxu0 %v1132_v13  ;;  %v848_v5 = vpop.permute.xlu1 %847 }
 0x154   : > { %v816_v2 = vpop.permute.xlu0 %815  ;;  %922 = vst.msk [vmem:[#allocation2 + $0x160] sm:$0xff] %vm899_vm5, %v848_v5 }
 0x155   : > { %906 = vst.msk [vmem:[#allocation2 + $0x60] sm:$0xff] %vm899_vm5, %v816_v2 }
 0x157   : > { %v1008_v22 = vpop.permute.xlu1 %1007  ;;  %v1166_v19 = vld [vmem:[#allocation2 + $0x150] sm:$0xff] }
 0x158   : > { %v1167_v55 = vld [vmem:[#allocation2 + $0x158] sm:$0xff]  ;;  %v976_v8 = vpop.permute.xlu0 %975  ;;  %1104 = vst.msk [vmem:[#allocation2 + $0x160] sm:$0xff] %vm1059_vm6, %v1008_v22 }
 0x159   : > { %1105 = vst.msk [vmem:[#allocation2 + $0x168] sm:$0xff] %vm643_vm2, %v1008_v22  ;;  %v1135_v49 = vld [vmem:[#allocation2 + $0x58] sm:$0xff]  ;;  %1719 = vmatprep.mubr.msk.f32.mxu1 %vm643_vm2, %v1167_v55  ;;  %v1134_v23 = vld [vmem:[#allocation2 + $0x50] sm:$0xff]  ;;  %1073 = vst.msk [vmem:[#allocation2 + $0x68] sm:$0xff] %vm643_vm2, %v976_v8 }
 0x15a   : > { %1072 = vst.msk [vmem:[#allocation2 + $0x60] sm:$0xff] %vm1059_vm6, %v976_v8  ;;  %1703 = vmatprep.mubr.msk.f32.mxu0 %vm643_vm2, %v1135_v49  ;;  %1479 = vmatmul.mubr.f32.gmra.mrb[10].mxu1 %v1166_v19 }
 0x15b   : > { %1399 = vmatmul.mubr.f32.gmra.mrb[10].mxu0 %v1134_v23  ;;  %v850_v3 = vpop.permute.xlu1 %849 }
 0x15c   : > { %v818_v48 = vpop.permute.xlu0 %817  ;;  %923 = vst.msk [vmem:[#allocation2 + $0x170] sm:$0xff] %vm899_vm5, %v850_v3 }
 0x15d   : > { %907 = vst.msk [vmem:[#allocation2 + $0x70] sm:$0xff] %vm899_vm5, %v818_v48 }
 0x15f   : > { %v1010_v1 = vpop.permute.xlu1 %1009  ;;  %v1168_v62 = vld [vmem:[#allocation2 + $0x160] sm:$0xff] }
 0x160   : > { %v1169_v24 = vld [vmem:[#allocation2 + $0x168] sm:$0xff]  ;;  %v978_v4 = vpop.permute.xlu0 %977  ;;  %1106 = vst.msk [vmem:[#allocation2 + $0x170] sm:$0xff] %vm1059_vm6, %v1010_v1 }
 0x161   : > { %1107 = vst.msk [vmem:[#allocation2 + $0x178] sm:$0xff] %vm643_vm2, %v1010_v1  ;;  %v1137_v14 = vld [vmem:[#allocation2 + $0x68] sm:$0xff]  ;;  %1720 = vmatprep.mubr.msk.f32.mxu1 %vm643_vm2, %v1169_v24  ;;  %v1136_v15 = vld [vmem:[#allocation2 + $0x60] sm:$0xff]  ;;  %1075 = vst.msk [vmem:[#allocation2 + $0x78] sm:$0xff] %vm643_vm2, %v978_v4 }
 0x162   : > { %1074 = vst.msk [vmem:[#allocation2 + $0x70] sm:$0xff] %vm1059_vm6, %v978_v4  ;;  %1704 = vmatprep.mubr.msk.f32.mxu0 %vm643_vm2, %v1137_v14  ;;  %1484 = vmatmul.mubr.f32.gmra.mrb[12].mxu1 %v1168_v62 }
 0x163   : > { %1404 = vmatmul.mubr.f32.gmra.mrb[12].mxu0 %v1136_v15  ;;  %v852_v7 = vpop.permute.xlu1 %851 }
 0x164   : > { %v820_v42 = vpop.permute.xlu0 %819  ;;  %924 = vst.msk [vmem:[#allocation2 + $0x180] sm:$0xff] %vm899_vm5, %v852_v7 }
 0x165   : > { %908 = vst.msk [vmem:[#allocation2 + $0x80] sm:$0xff] %vm899_vm5, %v820_v42 }
 0x167   : > { %v1012_v43 = vpop.permute.xlu1 %1011  ;;  %v1170_v50 = vld [vmem:[#allocation2 + $0x170] sm:$0xff] }
 0x168   : > { %v1171_v54 = vld [vmem:[#allocation2 + $0x178] sm:$0xff]  ;;  %v980_v51 = vpop.permute.xlu0 %979  ;;  %1108 = vst.msk [vmem:[#allocation2 + $0x180] sm:$0xff] %vm1059_vm6, %v1012_v43 }
 0x169   : > { %1109 = vst.msk [vmem:[#allocation2 + $0x188] sm:$0xff] %vm643_vm2, %v1012_v43  ;;  %v1139_v16 = vld [vmem:[#allocation2 + $0x78] sm:$0xff]  ;;  %1721 = vmatprep.mubr.msk.f32.mxu1 %vm643_vm2, %v1171_v54  ;;  %v1138_v53 = vld [vmem:[#allocation2 + $0x70] sm:$0xff]  ;;  %1077 = vst.msk [vmem:[#allocation2 + $0x88] sm:$0xff] %vm643_vm2, %v980_v51 }
 0x16a   : > { %1076 = vst.msk [vmem:[#allocation2 + $0x80] sm:$0xff] %vm1059_vm6, %v980_v51  ;;  %1705 = vmatprep.mubr.msk.f32.mxu0 %vm643_vm2, %v1139_v16  ;;  %1489 = vmatmul.mubr.f32.gmra.mrb[14].mxu1 %v1170_v50  ;;  %v2952_v50 = vld [vmem:[%s3113_s2] ss:$0 sm:$0xff] }
 0x16b   : > { %1409 = vmatmul.mubr.f32.gmra.mrb[14].mxu0 %v1138_v53  ;;  %v854_v34 = vpop.permute.xlu1 %853 }
 0x16c   : > { %v822_v47 = vpop.permute.xlu0 %821  ;;  %925 = vst.msk [vmem:[#allocation2 + $0x190] sm:$0xff] %vm899_vm5, %v854_v34 }
 0x16d   : > { %909 = vst.msk [vmem:[#allocation2 + $0x90] sm:$0xff] %vm899_vm5, %v822_v47 }
 0x16f   : > { %v1014_v21 = vpop.permute.xlu1 %1013  ;;  %v1172_v60 = vld [vmem:[#allocation2 + $0x180] sm:$0xff] }
 0x170   : > { %v1173_v0 = vld [vmem:[#allocation2 + $0x188] sm:$0xff]  ;;  %v982_v45 = vpop.permute.xlu0 %981  ;;  %1110 = vst.msk [vmem:[#allocation2 + $0x190] sm:$0xff] %vm1059_vm6, %v1014_v21 }
 0x171   : > { %1111 = vst.msk [vmem:[#allocation2 + $0x198] sm:$0xff] %vm643_vm2, %v1014_v21  ;;  %v1141_v20 = vld [vmem:[#allocation2 + $0x88] sm:$0xff]  ;;  %1722 = vmatprep.mubr.msk.f32.mxu1 %vm643_vm2, %v1173_v0  ;;  %v1140_v56 = vld [vmem:[#allocation2 + $0x80] sm:$0xff]  ;;  %1079 = vst.msk [vmem:[#allocation2 + $0x98] sm:$0xff] %vm643_vm2, %v982_v45 }
 0x172   : > { %1078 = vst.msk [vmem:[#allocation2 + $0x90] sm:$0xff] %vm1059_vm6, %v982_v45  ;;  %1706 = vmatprep.mubr.msk.f32.mxu0 %vm643_vm2, %v1141_v20  ;;  %1494 = vmatmul.mubr.f32.gmra.mrb[16].mxu1 %v1172_v60 }
 0x173   : > { %1414 = vmatmul.mubr.f32.gmra.mrb[16].mxu0 %v1140_v56  ;;  %v856_v59 = vpop.permute.xlu1 %855 }
 0x174   : > { %v824_v35 = vpop.permute.xlu0 %823  ;;  %926 = vst.msk [vmem:[#allocation2 + $0x1a0] sm:$0xff] %vm899_vm5, %v856_v59 }
 0x175   : > { %910 = vst.msk [vmem:[#allocation2 + $0xa0] sm:$0xff] %vm899_vm5, %v824_v35 }
 0x177   : > { %v1016_v52 = vpop.permute.xlu1 %1015  ;;  %v1174_v31 = vld [vmem:[#allocation2 + $0x190] sm:$0xff] }
 0x178   : > { %v1175_v25 = vld [vmem:[#allocation2 + $0x198] sm:$0xff]  ;;  %v984_v58 = vpop.permute.xlu0 %983  ;;  %1112 = vst.msk [vmem:[#allocation2 + $0x1a0] sm:$0xff] %vm1059_vm6, %v1016_v52 }
 0x179   : > { %1113 = vst.msk [vmem:[#allocation2 + $0x1a8] sm:$0xff] %vm643_vm2, %v1016_v52  ;;  %v1143_v63 = vld [vmem:[#allocation2 + $0x98] sm:$0xff]  ;;  %1723 = vmatprep.mubr.msk.f32.mxu1 %vm643_vm2, %v1175_v25  ;;  %v1142_v10 = vld [vmem:[#allocation2 + $0x90] sm:$0xff]  ;;  %1081 = vst.msk [vmem:[#allocation2 + $0xa8] sm:$0xff] %vm643_vm2, %v984_v58 }
 0x17a   : > { %1080 = vst.msk [vmem:[#allocation2 + $0xa0] sm:$0xff] %vm1059_vm6, %v984_v58  ;;  %1707 = vmatprep.mubr.msk.f32.mxu0 %vm643_vm2, %v1143_v63  ;;  %1499 = vmatmul.mubr.f32.gmra.mrb[18].mxu1 %v1174_v31 }
 0x17b   : > { %1419 = vmatmul.mubr.f32.gmra.mrb[18].mxu0 %v1142_v10  ;;  %v858_v29 = vpop.permute.xlu1 %857 }
 0x17c   : > { %v826_v46 = vpop.permute.xlu0 %825  ;;  %927 = vst.msk [vmem:[#allocation2 + $0x1b0] sm:$0xff] %vm899_vm5, %v858_v29 }
 0x17d   : > { %911 = vst.msk [vmem:[#allocation2 + $0xb0] sm:$0xff] %vm899_vm5, %v826_v46 }
 0x17f   : > { %v1018_v27 = vpop.permute.xlu1 %1017  ;;  %v1176_v41 = vld [vmem:[#allocation2 + $0x1a0] sm:$0xff] }
 0x180   : > { %v1177_v28 = vld [vmem:[#allocation2 + $0x1a8] sm:$0xff]  ;;  %v986_v30 = vpop.permute.xlu0 %985  ;;  %1114 = vst.msk [vmem:[#allocation2 + $0x1b0] sm:$0xff] %vm1059_vm6, %v1018_v27 }
 0x181   : > { %1115 = vst.msk [vmem:[#allocation2 + $0x1b8] sm:$0xff] %vm643_vm2, %v1018_v27  ;;  %v1145_v11 = vld [vmem:[#allocation2 + $0xa8] sm:$0xff]  ;;  %1724 = vmatprep.mubr.msk.f32.mxu1 %vm643_vm2, %v1177_v28  ;;  %v1144_v40 = vld [vmem:[#allocation2 + $0xa0] sm:$0xff]  ;;  %1083 = vst.msk [vmem:[#allocation2 + $0xb8] sm:$0xff] %vm643_vm2, %v986_v30 }
 0x182   : > { %1082 = vst.msk [vmem:[#allocation2 + $0xb0] sm:$0xff] %vm1059_vm6, %v986_v30  ;;  %1708 = vmatprep.mubr.msk.f32.mxu0 %vm643_vm2, %v1145_v11  ;;  %1504 = vmatmul.mubr.f32.gmra.mrb[20].mxu1 %v1176_v41 }
 0x183   : > { %1424 = vmatmul.mubr.f32.gmra.mrb[20].mxu0 %v1144_v40  ;;  %v860_v26 = vpop.permute.xlu1 %859 }
 0x184   : > { %v828_v44 = vpop.permute.xlu0 %827  ;;  %928 = vst.msk [vmem:[#allocation2 + $0x1c0] sm:$0xff] %vm899_vm5, %v860_v26 }
 0x185   : > { %912 = vst.msk [vmem:[#allocation2 + $0xc0] sm:$0xff] %vm899_vm5, %v828_v44 }
 0x187   : > { %v1020_v37 = vpop.permute.xlu1 %1019  ;;  %v1178_v57 = vld [vmem:[#allocation2 + $0x1b0] sm:$0xff] }
 0x188   : > { %v1179_v12 = vld [vmem:[#allocation2 + $0x1b8] sm:$0xff]  ;;  %v988_v33 = vpop.permute.xlu0 %987  ;;  %1116 = vst.msk [vmem:[#allocation2 + $0x1c0] sm:$0xff] %vm1059_vm6, %v1020_v37 }
 0x189   : > { %1117 = vst.msk [vmem:[#allocation2 + $0x1c8] sm:$0xff] %vm643_vm2, %v1020_v37  ;;  %v1147_v32 = vld [vmem:[#allocation2 + $0xb8] sm:$0xff]  ;;  %1725 = vmatprep.mubr.msk.f32.mxu1 %vm643_vm2, %v1179_v12  ;;  %v1146_v36 = vld [vmem:[#allocation2 + $0xb0] sm:$0xff]  ;;  %1085 = vst.msk [vmem:[#allocation2 + $0xc8] sm:$0xff] %vm643_vm2, %v988_v33 }
 0x18a   : > { %1084 = vst.msk [vmem:[#allocation2 + $0xc0] sm:$0xff] %vm1059_vm6, %v988_v33  ;;  %1709 = vmatprep.mubr.msk.f32.mxu0 %vm643_vm2, %v1147_v32  ;;  %1509 = vmatmul.mubr.f32.gmra.mrb[22].mxu1 %v1178_v57 }
 0x18b   : > { %1429 = vmatmul.mubr.f32.gmra.mrb[22].mxu0 %v1146_v36  ;;  %v862_v6 = vpop.permute.xlu1 %861 }
 0x18c   : > { %v830_v38 = vpop.permute.xlu0 %829  ;;  %929 = vst.msk [vmem:[#allocation2 + $0x1d0] sm:$0xff] %vm899_vm5, %v862_v6 }
 0x18d   : > { %913 = vst.msk [vmem:[#allocation2 + $0xd0] sm:$0xff] %vm899_vm5, %v830_v38 }
 0x18f   : > { %v1022_v9 = vpop.permute.xlu1 %1021  ;;  %v1180_v39 = vld [vmem:[#allocation2 + $0x1c0] sm:$0xff] }
 0x190   : > { %v1181_v61 = vld [vmem:[#allocation2 + $0x1c8] sm:$0xff]  ;;  %v990_v18 = vpop.permute.xlu0 %989  ;;  %1118 = vst.msk [vmem:[#allocation2 + $0x1d0] sm:$0xff] %vm1059_vm6, %v1022_v9 }
 0x191   : > { %1119 = vst.msk [vmem:[#allocation2 + $0x1d8] sm:$0xff] %vm643_vm2, %v1022_v9  ;;  %v1149_v17 = vld [vmem:[#allocation2 + $0xc8] sm:$0xff]  ;;  %1726 = vmatprep.mubr.msk.f32.mxu1 %vm643_vm2, %v1181_v61  ;;  %v1148_v13 = vld [vmem:[#allocation2 + $0xc0] sm:$0xff]  ;;  %1087 = vst.msk [vmem:[#allocation2 + $0xd8] sm:$0xff] %vm643_vm2, %v990_v18 }
 0x192   : > { %1086 = vst.msk [vmem:[#allocation2 + $0xd0] sm:$0xff] %vm1059_vm6, %v990_v18  ;;  %1710 = vmatprep.mubr.msk.f32.mxu0 %vm643_vm2, %v1149_v17  ;;  %1514 = vmatmul.mubr.f32.gmra.mrb[24].mxu1 %v1180_v39 }
 0x193   : > { %1434 = vmatmul.mubr.f32.gmra.mrb[24].mxu0 %v1148_v13  ;;  %v864_v5 = vpop.permute.xlu1 %863 }
 0x194   : > { %v832_v2 = vpop.permute.xlu0 %831  ;;  %930 = vst.msk [vmem:[#allocation2 + $0x1e0] sm:$0xff] %vm899_vm5, %v864_v5 }
 0x195   : > { %914 = vst.msk [vmem:[#allocation2 + $0xe0] sm:$0xff] %vm899_vm5, %v832_v2 }
 0x197   : > { %v1024_v22 = vpop.permute.xlu1 %1023  ;;  %v1182_v19 = vld [vmem:[#allocation2 + $0x1d0] sm:$0xff] }
 0x198   : > { %v1183_v55 = vld [vmem:[#allocation2 + $0x1d8] sm:$0xff]  ;;  %v992_v8 = vpop.permute.xlu0 %991  ;;  %1120 = vst.msk [vmem:[#allocation2 + $0x1e0] sm:$0xff] %vm1059_vm6, %v1024_v22 }
 0x199   : > { %1121 = vst.msk [vmem:[#allocation2 + $0x1e8] sm:$0xff] %vm643_vm2, %v1024_v22  ;;  %v1151_v49 = vld [vmem:[#allocation2 + $0xd8] sm:$0xff]  ;;  %1727 = vmatprep.mubr.msk.f32.mxu1 %vm643_vm2, %v1183_v55  ;;  %v1150_v23 = vld [vmem:[#allocation2 + $0xd0] sm:$0xff]  ;;  %1089 = vst.msk [vmem:[#allocation2 + $0xe8] sm:$0xff] %vm643_vm2, %v992_v8 }
 0x19a   : > { %1088 = vst.msk [vmem:[#allocation2 + $0xe0] sm:$0xff] %vm1059_vm6, %v992_v8  ;;  %1711 = vmatprep.mubr.msk.f32.mxu0 %vm643_vm2, %v1151_v49  ;;  %1519 = vmatmul.mubr.f32.gmra.mrb[26].mxu1 %v1182_v19 }
 0x19b   : > { %1439 = vmatmul.mubr.f32.gmra.mrb[26].mxu0 %v1150_v23  ;;  %v866_v3 = vpop.permute.xlu1 %865 }
 0x19c   : > { %v834_v48 = vpop.permute.xlu0 %833  ;;  %931 = vst.msk [vmem:[#allocation2 + $0x1f0] sm:$0xff] %vm899_vm5, %v866_v3 }
 0x19d   : > { %915 = vst.msk [vmem:[#allocation2 + $0xf0] sm:$0xff] %vm899_vm5, %v834_v48 }
 0x19f   : > { %v1026_v1 = vpop.permute.xlu1 %1025  ;;  %v1184_v62 = vld [vmem:[#allocation2 + $0x1e0] sm:$0xff] }
 0x1a0   : > { %v1185_v24 = vld [vmem:[#allocation2 + $0x1e8] sm:$0xff]  ;;  %v994_v4 = vpop.permute.xlu0 %993  ;;  %1122 = vst.msk [vmem:[#allocation2 + $0x1f0] sm:$0xff] %vm1059_vm6, %v1026_v1 }
 0x1a1   : > { %1123 = vst.msk [vmem:[#allocation2 + $0x1f8] sm:$0xff] %vm643_vm2, %v1026_v1  ;;  %v1153_v14 = vld [vmem:[#allocation2 + $0xe8] sm:$0xff]  ;;  %1728 = vmatprep.mubr.msk.f32.mxu1 %vm643_vm2, %v1185_v24  ;;  %v1152_v15 = vld [vmem:[#allocation2 + $0xe0] sm:$0xff]  ;;  %1091 = vst.msk [vmem:[#allocation2 + $0xf8] sm:$0xff] %vm643_vm2, %v994_v4 }
 0x1a2   : > { %1090 = vst.msk [vmem:[#allocation2 + $0xf0] sm:$0xff] %vm1059_vm6, %v994_v4  ;;  %1712 = vmatprep.mubr.msk.f32.mxu0 %vm643_vm2, %v1153_v14  ;;  %1524 = vmatmul.mubr.f32.gmra.mrb[28].mxu1 %v1184_v62 }
 0x1a3   : > { %1444 = vmatmul.mubr.f32.gmra.mrb[28].mxu0 %v1152_v15 }
 0x1a7   : > { %v1186_v42 = vld [vmem:[#allocation2 + $0x1f0] sm:$0xff] }
 0x1a8   : > { %v1187_v7 = vld [vmem:[#allocation2 + $0x1f8] sm:$0xff] }
 0x1a9   : > { %v1155_v43 = vld [vmem:[#allocation2 + $0xf8] sm:$0xff]  ;;  %1729 = vmatprep.mubr.msk.f32.mxu1 %vm643_vm2, %v1187_v7  ;;  %v1154_v54 = vld [vmem:[#allocation2 + $0xf0] sm:$0xff] }
 0x1aa   : > { %1713 = vmatprep.mubr.msk.f32.mxu0 %vm643_vm2, %v1155_v43  ;;  %1529 = vmatmul.mubr.f32.gmra.mrb[30].mxu1 %v1186_v42 }
 0x1ab   : > { %1449 = vmatmul.mubr.f32.gmra.mrb[30].mxu0 %v1154_v54 }
 0x1fd   : > { %v1375_v51 = vpop.f32.mrb[0].mxu0 }
 0x1fe   : > { %v1376_v16 = vadd.f32 %v2952_v50, %v1375_v51  ;;  %v1377_v53 = vpop.f32.mrb[1].mxu0 }
 0x200   : > { %v1534_v34 = vmax.f32 %v1376_v16, 0.0 }
 0x202   : > { %1566 = vst.msk [vmem:[%s2957_s26] sm:$0xff] %vm676_vm3, %v1534_v34  ;;  %v1455_v47 = vpop.f32.mrb[0].mxu1 }
 0x203   : > { %v1456_v21 = vadd.f32 %v2952_v50, %v1455_v47  ;;  %v1457_v0 = vpop.f32.mrb[1].mxu1 }
 0x205   : > { %v1550_v60 = vmax.f32 %v1456_v21, 0.0 }
 0x207   : > { %1582 = vst.msk [vmem:[%s2957_s26 + $0x80] sm:$0xff] %vm676_vm3, %v1550_v60 }
 0x20d   : > { %v1460_v45 = vpop.f32.mrb[2].mxu1 }
 0x20e   : > { %v1380_v20 = vpop.f32.mrb[2].mxu0  ;;  %v1461_v56 = vadd.f32 %v2952_v50, %v1460_v45  ;;  %v1462_v59 = vpop.f32.mrb[3].mxu1 }
 0x20f   : > { %v1381_v35 = vadd.f32 %v2952_v50, %v1380_v20  ;;  %v1382_v52 = vpop.f32.mrb[3].mxu0 }
 0x210   : > { %v1551_v25 = vmax.f32 %v1461_v56, 0.0 }
 0x211   : > { %v1535_v31 = vmax.f32 %v1381_v35, 0.0 }
 0x212   : > { %1583 = vst.msk [vmem:[%s2957_s26 + $0x88] sm:$0xff] %vm676_vm3, %v1551_v25 }
 0x213   : > { %1567 = vst.msk [vmem:[%s2957_s26 + $0x8] sm:$0xff] %vm676_vm3, %v1535_v31 }
 0x215   : > { %v1465_v58 = vpop.f32.mrb[4].mxu1 }
 0x216   : > { %v1385_v63 = vpop.f32.mrb[4].mxu0  ;;  %v1466_v10 = vadd.f32 %v2952_v50, %v1465_v58  ;;  %v1467_v29 = vpop.f32.mrb[5].mxu1 }
 0x217   : > { %v1386_v46 = vadd.f32 %v2952_v50, %v1385_v63  ;;  %v1387_v27 = vpop.f32.mrb[5].mxu0 }
 0x218   : > { %v1552_v28 = vmax.f32 %v1466_v10, 0.0 }
 0x219   : > { %v1536_v41 = vmax.f32 %v1386_v46, 0.0 }
 0x21a   : > { %1584 = vst.msk [vmem:[%s2957_s26 + $0x90] sm:$0xff] %vm676_vm3, %v1552_v28 }
 0x21b   : > { %1568 = vst.msk [vmem:[%s2957_s26 + $0x10] sm:$0xff] %vm676_vm3, %v1536_v41 }
 0x21d   : > { %v1470_v30 = vpop.f32.mrb[6].mxu1 }
 0x21e   : > { %v1390_v11 = vpop.f32.mrb[6].mxu0  ;;  %v1471_v40 = vadd.f32 %v2952_v50, %v1470_v30  ;;  %v1472_v26 = vpop.f32.mrb[7].mxu1 }
 0x21f   : > { %v1391_v44 = vadd.f32 %v2952_v50, %v1390_v11  ;;  %v1392_v37 = vpop.f32.mrb[7].mxu0 }
 0x220   : > { %v1553_v12 = vmax.f32 %v1471_v40, 0.0 }
 0x221   : > { %v1537_v57 = vmax.f32 %v1391_v44, 0.0 }
 0x222   : > { %1585 = vst.msk [vmem:[%s2957_s26 + $0x98] sm:$0xff] %vm676_vm3, %v1553_v12 }
 0x223   : > { %1569 = vst.msk [vmem:[%s2957_s26 + $0x18] sm:$0xff] %vm676_vm3, %v1537_v57 }
 0x225   : > { %v1475_v33 = vpop.f32.mrb[8].mxu1 }
 0x226   : > { %v1395_v32 = vpop.f32.mrb[8].mxu0  ;;  %v1476_v36 = vadd.f32 %v2952_v50, %v1475_v33  ;;  %v1477_v6 = vpop.f32.mrb[9].mxu1 }
 0x227   : > { %v1396_v38 = vadd.f32 %v2952_v50, %v1395_v32  ;;  %v1397_v9 = vpop.f32.mrb[9].mxu0 }
 0x228   : > { %v1554_v61 = vmax.f32 %v1476_v36, 0.0 }
 0x229   : > { %v1538_v39 = vmax.f32 %v1396_v38, 0.0 }
 0x22a   : > { %1586 = vst.msk [vmem:[%s2957_s26 + $0xa0] sm:$0xff] %vm676_vm3, %v1554_v61 }
 0x22b   : > { %1570 = vst.msk [vmem:[%s2957_s26 + $0x20] sm:$0xff] %vm676_vm3, %v1538_v39 }
 0x22d   : > { %v1480_v18 = vpop.f32.mrb[10].mxu1 }
 0x22e   : > { %v1400_v17 = vpop.f32.mrb[10].mxu0  ;;  %v1481_v13 = vadd.f32 %v2952_v50, %v1480_v18  ;;  %v1482_v5 = vpop.f32.mrb[11].mxu1 }
 0x22f   : > { %v1401_v2 = vadd.f32 %v2952_v50, %v1400_v17  ;;  %v1402_v22 = vpop.f32.mrb[11].mxu0 }
 0x230   : > { %v1555_v55 = vmax.f32 %v1481_v13, 0.0 }
 0x231   : > { %v1539_v19 = vmax.f32 %v1401_v2, 0.0 }
 0x232   : > { %1587 = vst.msk [vmem:[%s2957_s26 + $0xa8] sm:$0xff] %vm676_vm3, %v1555_v55 }
 0x233   : > { %1571 = vst.msk [vmem:[%s2957_s26 + $0x28] sm:$0xff] %vm676_vm3, %v1539_v19 }
 0x235   : > { %v1485_v8 = vpop.f32.mrb[12].mxu1 }
 0x236   : > { %v1405_v49 = vpop.f32.mrb[12].mxu0  ;;  %v1486_v23 = vadd.f32 %v2952_v50, %v1485_v8  ;;  %v1487_v3 = vpop.f32.mrb[13].mxu1 }
 0x237   : > { %v1406_v48 = vadd.f32 %v2952_v50, %v1405_v49  ;;  %v1407_v1 = vpop.f32.mrb[13].mxu0 }
 0x238   : > { %v1556_v24 = vmax.f32 %v1486_v23, 0.0 }
 0x239   : > { %v1540_v62 = vmax.f32 %v1406_v48, 0.0 }
 0x23a   : > { %1588 = vst.msk [vmem:[%s2957_s26 + $0xb0] sm:$0xff] %vm676_vm3, %v1556_v24 }
 0x23b   : > { %1572 = vst.msk [vmem:[%s2957_s26 + $0x30] sm:$0xff] %vm676_vm3, %v1540_v62 }
 0x23d   : > { %v1490_v4 = vpop.f32.mrb[14].mxu1 }
 0x23e   : > { %v1410_v14 = vpop.f32.mrb[14].mxu0  ;;  %v1491_v15 = vadd.f32 %v2952_v50, %v1490_v4  ;;  %v1492_v7 = vpop.f32.mrb[15].mxu1 }
 0x23f   : > { %v1411_v42 = vadd.f32 %v2952_v50, %v1410_v14  ;;  %v1412_v43 = vpop.f32.mrb[15].mxu0 }
 0x240   : > { %v1557_v54 = vmax.f32 %v1491_v15, 0.0 }
 0x241   : > { %v1541_v51 = vmax.f32 %v1411_v42, 0.0 }
 0x242   : > { %1589 = vst.msk [vmem:[%s2957_s26 + $0xb8] sm:$0xff] %vm676_vm3, %v1557_v54 }
 0x243   : > { %1573 = vst.msk [vmem:[%s2957_s26 + $0x38] sm:$0xff] %vm676_vm3, %v1541_v51 }
 0x245   : > { %v1495_v16 = vpop.f32.mrb[16].mxu1 }
 0x246   : > { %v1415_v53 = vpop.f32.mrb[16].mxu0  ;;  %v1496_v34 = vadd.f32 %v2952_v50, %v1495_v16  ;;  %v1497_v47 = vpop.f32.mrb[17].mxu1 }
 0x247   : > { %v1416_v21 = vadd.f32 %v2952_v50, %v1415_v53  ;;  %v1417_v0 = vpop.f32.mrb[17].mxu0 }
 0x248   : > { %v1558_v60 = vmax.f32 %v1496_v34, 0.0 }
 0x249   : > { %v1542_v45 = vmax.f32 %v1416_v21, 0.0 }
 0x24a   : > { %1590 = vst.msk [vmem:[%s2957_s26 + $0xc0] sm:$0xff] %vm676_vm3, %v1558_v60 }
 0x24b   : > { %1574 = vst.msk [vmem:[%s2957_s26 + $0x40] sm:$0xff] %vm676_vm3, %v1542_v45 }
 0x24d   : > { %v1500_v20 = vpop.f32.mrb[18].mxu1 }
 0x24e   : > { %v1420_v56 = vpop.f32.mrb[18].mxu0  ;;  %v1501_v59 = vadd.f32 %v2952_v50, %v1500_v20  ;;  %v1502_v35 = vpop.f32.mrb[19].mxu1 }
 0x24f   : > { %v1421_v52 = vadd.f32 %v2952_v50, %v1420_v56  ;;  %v1422_v25 = vpop.f32.mrb[19].mxu0 }
 0x250   : > { %v1559_v31 = vmax.f32 %v1501_v59, 0.0 }
 0x251   : > { %v1543_v58 = vmax.f32 %v1421_v52, 0.0 }
 0x252   : > { %1591 = vst.msk [vmem:[%s2957_s26 + $0xc8] sm:$0xff] %vm676_vm3, %v1559_v31 }
 0x253   : > { %1575 = vst.msk [vmem:[%s2957_s26 + $0x48] sm:$0xff] %vm676_vm3, %v1543_v58 }
 0x255   : > { %v1505_v63 = vpop.f32.mrb[20].mxu1 }
 0x256   : > { %v1425_v10 = vpop.f32.mrb[20].mxu0  ;;  %v1506_v29 = vadd.f32 %v2952_v50, %v1505_v63  ;;  %v1507_v46 = vpop.f32.mrb[21].mxu1 }
 0x257   : > { %v1426_v27 = vadd.f32 %v2952_v50, %v1425_v10  ;;  %v1427_v28 = vpop.f32.mrb[21].mxu0 }
 0x258   : > { %v1560_v41 = vmax.f32 %v1506_v29, 0.0 }
 0x259   : > { %v1544_v30 = vmax.f32 %v1426_v27, 0.0 }
 0x25a   : > { %1592 = vst.msk [vmem:[%s2957_s26 + $0xd0] sm:$0xff] %vm676_vm3, %v1560_v41 }
 0x25b   : > { %1576 = vst.msk [vmem:[%s2957_s26 + $0x50] sm:$0xff] %vm676_vm3, %v1544_v30 }
 0x25d   : > { %v1510_v11 = vpop.f32.mrb[22].mxu1 }
 0x25e   : > { %v1430_v40 = vpop.f32.mrb[22].mxu0  ;;  %v1511_v26 = vadd.f32 %v2952_v50, %v1510_v11  ;;  %v1512_v44 = vpop.f32.mrb[23].mxu1 }
 0x25f   : > { %v1431_v37 = vadd.f32 %v2952_v50, %v1430_v40  ;;  %v1432_v12 = vpop.f32.mrb[23].mxu0 }
 0x260   : > { %v1561_v57 = vmax.f32 %v1511_v26, 0.0 }
 0x261   : > { %v1545_v33 = vmax.f32 %v1431_v37, 0.0 }
 0x262   : > { %1593 = vst.msk [vmem:[%s2957_s26 + $0xd8] sm:$0xff] %vm676_vm3, %v1561_v57 }
 0x263   : > { %1577 = vst.msk [vmem:[%s2957_s26 + $0x58] sm:$0xff] %vm676_vm3, %v1545_v33 }
 0x265   : > { %v1515_v32 = vpop.f32.mrb[24].mxu1 }
 0x266   : > { %v1435_v36 = vpop.f32.mrb[24].mxu0  ;;  %v1516_v6 = vadd.f32 %v2952_v50, %v1515_v32  ;;  %v1517_v38 = vpop.f32.mrb[25].mxu1 }
 0x267   : > { %v1436_v9 = vadd.f32 %v2952_v50, %v1435_v36  ;;  %v1437_v61 = vpop.f32.mrb[25].mxu0 }
 0x268   : > { %v1562_v39 = vmax.f32 %v1516_v6, 0.0 }
 0x269   : > { %v1546_v18 = vmax.f32 %v1436_v9, 0.0 }
 0x26a   : > { %1594 = vst.msk [vmem:[%s2957_s26 + $0xe0] sm:$0xff] %vm676_vm3, %v1562_v39 }
 0x26b   : > { %1578 = vst.msk [vmem:[%s2957_s26 + $0x60] sm:$0xff] %vm676_vm3, %v1546_v18 }
 0x26d   : > { %v1520_v17 = vpop.f32.mrb[26].mxu1 }
 0x26e   : > { %v1440_v13 = vpop.f32.mrb[26].mxu0  ;;  %v1521_v5 = vadd.f32 %v2952_v50, %v1520_v17  ;;  %v1522_v2 = vpop.f32.mrb[27].mxu1 }
 0x26f   : > { %v1441_v22 = vadd.f32 %v2952_v50, %v1440_v13  ;;  %v1442_v55 = vpop.f32.mrb[27].mxu0 }
 0x270   : > { %v1563_v19 = vmax.f32 %v1521_v5, 0.0 }
 0x271   : > { %v1547_v8 = vmax.f32 %v1441_v22, 0.0 }
 0x272   : > { %1595 = vst.msk [vmem:[%s2957_s26 + $0xe8] sm:$0xff] %vm676_vm3, %v1563_v19 }
 0x273   : > { %1579 = vst.msk [vmem:[%s2957_s26 + $0x68] sm:$0xff] %vm676_vm3, %v1547_v8 }
 0x275   : > { %v1525_v49 = vpop.f32.mrb[28].mxu1 }
 0x276   : > { %v1445_v23 = vpop.f32.mrb[28].mxu0  ;;  %v1526_v3 = vadd.f32 %v2952_v50, %v1525_v49  ;;  %v1527_v48 = vpop.f32.mrb[29].mxu1 }
 0x277   : > { %v1446_v1 = vadd.f32 %v2952_v50, %v1445_v23  ;;  %v1447_v24 = vpop.f32.mrb[29].mxu0 }
 0x278   : > { %v1564_v62 = vmax.f32 %v1526_v3, 0.0 }
 0x279   : > { %v1548_v4 = vmax.f32 %v1446_v1, 0.0 }
 0x27a   : > { %1596 = vst.msk [vmem:[%s2957_s26 + $0xf0] sm:$0xff] %vm676_vm3, %v1564_v62 }
 0x27b   : > { %1580 = vst.msk [vmem:[%s2957_s26 + $0x70] sm:$0xff] %vm676_vm3, %v1548_v4 }
 0x27d   : > { %v1530_v14 = vpop.f32.mrb[30].mxu1 }
 0x27e   : > { %v1450_v15 = vpop.f32.mrb[30].mxu0  ;;  %v1531_v7 = vadd.f32 %v2952_v50, %v1530_v14  ;;  %v1532_v42 = vpop.f32.mrb[31].mxu1 }
 0x27f   : > { %v1451_v43 = vadd.f32 %v2952_v50, %v1450_v15  ;;  %v1452_v54 = vpop.f32.mrb[31].mxu0 }
 0x280   : > { %v1565_v51 = vmax.f32 %v1531_v7, 0.0 }
 0x281   : > { %v1549_v16 = vmax.f32 %v1451_v43, 0.0 }
 0x282   : > { %1597 = vst.msk [vmem:[%s2957_s26 + $0xf8] sm:$0xff] %vm676_vm3, %v1565_v51 }
 0x283   : > { %1581 = vst.msk [vmem:[%s2957_s26 + $0x78] sm:$0xff] %vm676_vm3, %v1549_v16 }
 0x284   : > { %1857 = shalt.err (!%p1854_p5)
}
 0x285   : > { %s1858_s18 = scalar_lea.hbm %s3055_s7, 4096  ;;  %s1862_s4 = scalar_lea.hbm %s3114_s3, 8192 }
 0x286   : > { %p1859_p6 = scmp.ne.s32.totalorder %s3055_s7, %s1858_s18  ;;  %p1863_p10 = scmp.lt.u32.totalorder %s3055_s7, %s3114_s3 }
 0x287   : > { %p1864_p11 = scmp.lt.u32.totalorder %s1862_s4, %s1858_s18  ;;  %p1866_p13 = scmp.lt.u32.totalorder %s1858_s18, %s3055_s7 }
 0x288   : > { %p1860_p7 = pnand %p1859_p6, %p1992_p4 }
 0x289   : > { %p1865_p12 = por %p1864_p11, %p1863_p10 }
 0x28a   : > { %p1861_p9 = pneg %p1860_p7 }
 0x28b   : > { %p1867_p0 = por %p1866_p13, %p1865_p12 }
 0x28d   : > { %p1868_p1 = pnand %p1867_p0, %p1861_p9 }
 0x28f   : > { %1871 = shalt.err (!%p1868_p1)
}
 0x290   : > { %s1930_s30 = smov 128   ;;  %s1931_s26 = smov 8  }
 0x291   : > { %1782 = dma.vmem_to_hbm [thread:$0]  (%p1992_p4), %s3057_s28, 4096, %s3055_s7, %s3065_s15, %s1930_s30, %s1930_s30, %s1931_s26  }
 0x292 PF: > { %p1788_p2 = scmp.ge.s32.totalorder %s1922_s17, 2  ;;  %s1630_s27 = sand.u32 1, %s1902_s12  }
 0x293   : > { %s1631_s29 = scalar_lea.sflag [#allocation4], %s1630_s27 }
 0x294   : > { %p1785_p3 = pnand %p1788_p2, %p1999_p8 }
 0x296   : > { %1897 = dma.done.wait (!%p1785_p3), %s1631_s29, 4096  }
 0x297   : > { %1899 = vsyncadd (!%p1785_p3), %s1631_s29, 4294963200  ;;  %s16_s17 = sadd.s32 1, %s1922_s17   ;;  %s3160_s12 = smov %s1906_s13 }
 0x298   : > { %p13_p5 = scmp.ge.s32.totalorder %s16_s17, 4   ;;  %s3161_s13 = smov %s1910_s14 }
 0x299   : > { %s3162_s14 = smov %s2005_s25  ;;  %s3163_s15 = smov %s1918_s16 }
 0x29a   : > { %s3164_s16 = smov %s3166_s20  ;;  %15 = sbr.rel (!%p13_p5) target bundleno = 4 (0x4), region = 68 }
 0x2a1   :  { %1636 = vsyncpa [#allocation4], 1 }
 0x2a2   :  { %1638 = vsyncpa [#allocation4 + $0x1], 1 }

</bundles_post_ra>
